<compile_context>
chip_gen: v7x
topology: tpu7x:2x2x1
jax: 0.10.0
libtpu: 0.0.40
codegen_flags: <defaults>
</compile_context>

<pallas_src>
import functools

import jax
import jax.numpy as jnp
from jax.experimental import pallas as pl
from jax.experimental.pallas import tpu as pltpu


def _round_up(a, b):
    return ((a + b - 1) // b) * b


def _autoencoder_kernel(x_ref, w_ref, b0_ref, out_ref, *,
                        cm, c_in, c_out, n_layers):
    """Fused 8-layer MLP, batch-major: h <- relu(h @ W'_i), biases folded in W'."""
    tm = x_ref.shape[0]
    n_chunks = tm // cm

    # Layer-0 bias row (f32) — also carries the seed "1" for the ones column used
    # by the folded biases of layers 1..n-1.  Tiny; hoisted out of the chunk loop.
    b0 = b0_ref[0:1, :]                                        # f32 [1, P]

    @pl.loop(0, n_chunks)
    def _(c):
        lo = pl.multiple_of(c * cm, cm)
        x_chunk = x_ref[pl.ds(lo, cm), :].astype(w_ref.dtype)  # bf16 [cm, c_in]

        # Layer 0: explicit bias add (seeds the ones column at relu(0 + 1) = 1).
        acc = jnp.dot(x_chunk, w_ref[0, 0:c_in, :],
                      preferred_element_type=jnp.float32)      # f32 [cm, P]
        h = jnp.maximum(acc + b0, 0.0).astype(w_ref.dtype)     # bf16 activations

        # Layers 1..n-1: bias folded into the padded weight slab via the ones col.
        for i in range(1, n_layers):
            acc = jnp.dot(h, w_ref[i], preferred_element_type=jnp.float32)
            h = jnp.maximum(acc, 0.0).astype(w_ref.dtype)

        out_ref[pl.ds(lo, cm), :] = h[:, 0:c_out].astype(out_ref.dtype)


def feature_autoencoder(x, weights, biases, *, tm=8192, cm=256,
                        matmul_dtype=jnp.bfloat16, out_dtype=None):
    """x: [N, in_ch].  weights[i]: [out_i, in_i] (PyTorch layout), biases[i]: [out_i]."""
    N, c_in = x.shape
    n_layers = len(weights)
    out_dims = [int(w.shape[0]) for w in weights]
    in_dims = [int(w.shape[1]) for w in weights]
    assert in_dims[0] == c_in and out_dims[-1] == c_in
    for i in range(1, n_layers):
        assert in_dims[i] == out_dims[i - 1]
    c_out = out_dims[-1]
    out_dtype = x.dtype if out_dtype is None else out_dtype

    LANE = 128
    # ---- batch-axis tiling ----------------------------------------------------
    cm_eff = max(LANE, (cm // LANE) * LANE)               # sub-chunk, multiple of 128
    n_min = _round_up(max(N, 1), cm_eff)
    tm_req = max(cm_eff, (tm // cm_eff) * cm_eff)
    steps = max(1, pl.cdiv(n_min, tm_req))
    if n_min >= 2 * cm_eff:
        steps = max(steps, 2)                              # v7x megacore: >= 2 steps
        if steps % 2:                                      # keep the 2 TCs balanced
            steps += 1
    tm_eff = _round_up(pl.cdiv(n_min, steps), cm_eff)      # balanced, multiple of cm
    n_pad = pl.cdiv(N, tm_eff) * tm_eff
    grid = (n_pad // tm_eff,)

    # Zero-pad ragged batch rows only (no transpose pass; stays batch-major).
    if n_pad != N:
        x_in = jnp.zeros((n_pad, c_in), x.dtype).at[:N, :].set(x)
    else:
        x_in = x

    # ---- pack all weights (+ folded biases) into one padded bf16 slab ---------
    max_dim = max(max(out_dims), max(in_dims))
    P = _round_up(max_dim + 1, 8)       # +1 for the constant-ones feature column
    ones_idx = max_dim
    w_slab = jnp.zeros((n_layers, P, P), jnp.float32)
    for i, (w, b) in enumerate(zip(weights, biases)):
        o, k = int(w.shape[0]), int(w.shape[1])
        w_slab = w_slab.at[i, :k, :o].set(w.astype(jnp.float32).T)
        if i > 0:
            w_slab = w_slab.at[i, ones_idx, :o].set(b.astype(jnp.float32))
            w_slab = w_slab.at[i, ones_idx, ones_idx].set(1.0)   # propagate the 1
    w_slab = w_slab.astype(matmul_dtype)

    # Layer-0 bias (kept f32) + the seed "1" for the ones column.
    b0 = jnp.zeros((8, P), jnp.float32)
    b0 = b0.at[0, :out_dims[0]].set(biases[0].astype(jnp.float32))
    b0 = b0.at[0, ones_idx].set(1.0)

    kernel = functools.partial(_autoencoder_kernel, cm=cm_eff, c_in=c_in,
                               c_out=c_out, n_layers=n_layers)

    out = pl.pallas_call(
        kernel,
        out_shape=jax.ShapeDtypeStruct((n_pad, c_out), out_dtype),
        grid_spec=pltpu.PrefetchScalarGridSpec(
            num_scalar_prefetch=0,
            grid=grid,
            in_specs=[
                pl.BlockSpec((tm_eff, c_in), lambda i: (i, 0)),
                pl.BlockSpec((n_layers, P, P), lambda i: (0, 0, 0)),  # resident
                pl.BlockSpec((8, P), lambda i: (0, 0)),               # resident
            ],
            out_specs=pl.BlockSpec((tm_eff, c_out), lambda i: (i, 0)),
        ),
        compiler_params=pltpu.CompilerParams(
            dimension_semantics=("parallel",)),
    )(x_in, w_slab, b0)

    return out[:N] if n_pad != N else out


def init_params(key, in_channels, inner_hidden_channels, inner_out_channels,
                out_channels, dtype=jnp.float32):
    """Deterministic init mirroring the module's Linear layers (PyTorch [out, in])."""
    dims = [
        # encoder
        (in_channels, inner_hidden_channels),
        (inner_hidden_channels, inner_hidden_channels),
        (inner_hidden_channels, inner_out_channels),
        (inner_out_channels, out_channels),
        # decoder
        (out_channels, inner_out_channels),
        (inner_out_channels, inner_hidden_channels),
        (inner_hidden_channels, inner_hidden_channels),
        (inner_hidden_channels, in_channels),
    ]
    weights, biases = [], []
    for fan_in, fan_out in dims:
        key, wk, bk = jax.random.split(key, 3)
        bound = 1.0 / float(fan_in) ** 0.5
        weights.append(jax.random.uniform(wk, (fan_out, fan_in), dtype, -bound, bound))
        biases.append(jax.random.uniform(bk, (fan_out,), dtype, -bound, bound))
    return weights, biases


def reference_forward(x, weights, biases, matmul_dtype=jnp.bfloat16):
    """Pure-JAX reference mirroring the kernel numerics: bf16 matmul operands,
    f32 accumulation, bf16 inter-layer activations, bf16-cast folded biases."""
    h = x.astype(matmul_dtype)
    for i, (w, b) in enumerate(zip(weights, biases)):
        acc = jnp.dot(h, w.astype(matmul_dtype).T,
                      preferred_element_type=jnp.float32)
        if i == 0:
            b_eff = b.astype(jnp.float32)
        else:
            b_eff = b.astype(matmul_dtype).astype(jnp.float32)
        h = jnp.maximum(acc + b_eff, 0.0).astype(matmul_dtype)
    return h.astype(jnp.float32)


if __name__ == "__main__":
    in_channels = 32
    inner_hidden_channels = 64
    inner_out_channels = 32
    out_channels = 16
    batch = 20   # deliberately not a multiple of the tile: exercises the padding path

    key = jax.random.PRNGKey(0)
    xkey, pkey = jax.random.split(key)
    x = jax.random.normal(xkey, (batch, in_channels), jnp.float32)
    weights, biases = init_params(pkey, in_channels, inner_hidden_channels,
                                  inner_out_channels, out_channels)

    out = feature_autoencoder(x, weights, biases)
    out = jax.block_until_ready(out)

    ref = reference_forward(x, weights, biases)
    assert out.shape == (batch, in_channels)
    err = float(jnp.max(jnp.abs(out - ref)))
    assert jnp.allclose(out, ref, atol=2e-3, rtol=2e-3), err

    print("KERNEL_OK")
</pallas_src>

<mosaic_0001>
module attributes {stable_mosaic.version = 11 : i64} {
  func.func @_autoencoder_kernel(%arg0: i32, %arg1: memref<256x32xf32, #tpu.memory_space<vmem>>, %arg2: memref<8x72x72xbf16, #tpu.memory_space<vmem>>, %arg3: memref<8x72xf32, #tpu.memory_space<vmem>>, %arg4: memref<256x32xf32, #tpu.memory_space<vmem>>) attributes {dimension_semantics = [#tpu.dimension_semantics<parallel>], iteration_bounds = array<i64: 1>, scalar_prefetch = 0 : i64, scratch_operands = 0 : i64, tpu.core_type = #tpu.core_type<tc>, window_params = [{transform_indices = @transform_0, window_bounds = array<i64: 256, 32>}, {pipeline_mode = #tpu.pipeline_mode<synchronous>, transform_indices = @transform_1, window_bounds = array<i64: 8, 72, 72>}, {pipeline_mode = #tpu.pipeline_mode<synchronous>, transform_indices = @transform_2, window_bounds = array<i64: 8, 72>}, {transform_indices = @transform_3, window_bounds = array<i64: 256, 32>}]} {
    %c0 = arith.constant 0 : index
    %c0_0 = arith.constant 0 : index
    %0 = vector.load %arg3[%c0, %c0_0] : memref<8x72xf32, #tpu.memory_space<vmem>>, vector<1x72xf32>
    %c0_i32 = arith.constant 0 : i32
    %c1_i32 = arith.constant 1 : i32
    %1 = arith.muli %c0_i32, %c1_i32 : i32
    %c0_i32_1 = arith.constant 0 : i32
    %2 = arith.addi %c0_i32_1, %1 : i32
    %c256_i32 = arith.constant 256 : i32
    %3 = arith.muli %2, %c256_i32 : i32
    %4 = tpu.assume_multiple %3, 256 : i32
    %5 = arith.index_cast %4 : i32 to index
    %c0_2 = arith.constant 0 : index
    %6 = vector.load %arg1[%5, %c0_2] : memref<256x32xf32, #tpu.memory_space<vmem>>, vector<256x32xf32>
    %7 = arith.truncf %6 : vector<256x32xf32> to vector<256x32xbf16>
    %c0_3 = arith.constant 0 : index
    %c0_4 = arith.constant 0 : index
    %c0_5 = arith.constant 0 : index
    %8 = vector.load %arg2[%c0_3, %c0_4, %c0_5] : memref<8x72x72xbf16, #tpu.memory_space<vmem>>, vector<1x32x72xbf16>
    %9 = vector.shape_cast %8 : vector<1x32x72xbf16> to vector<32x72xbf16>
    %cst = arith.constant dense<0.000000e+00> : vector<256x72xf32>
    %10 = tpu.matmul %7, %9, %cst {dimension_numbers = #tpu.dot_dimension_numbers<[1], [0], [0], [1], [0, 0, 1, 1], [], []>} : vector<256x32xbf16>, vector<32x72xbf16>, vector<256x72xf32> -> vector<256x72xf32>
    %11 = vector.broadcast %0 : vector<1x72xf32> to vector<256x72xf32>
    %12 = arith.addf %10, %11 : vector<256x72xf32>
    %cst_6 = arith.constant 0.000000e+00 : f32
    %13 = vector.broadcast %cst_6 : f32 to vector<256x72xf32>
    %14 = arith.maximumf %12, %13 : vector<256x72xf32>
    %15 = arith.truncf %14 : vector<256x72xf32> to vector<256x72xbf16>
    %c1 = arith.constant 1 : index
    %c0_7 = arith.constant 0 : index
    %c0_8 = arith.constant 0 : index
    %16 = vector.load %arg2[%c1, %c0_7, %c0_8] : memref<8x72x72xbf16, #tpu.memory_space<vmem>>, vector<1x72x72xbf16>
    %17 = vector.shape_cast %16 : vector<1x72x72xbf16> to vector<72x72xbf16>
    %cst_9 = arith.constant dense<0.000000e+00> : vector<256x72xf32>
    %18 = tpu.matmul %15, %17, %cst_9 {dimension_numbers = #tpu.dot_dimension_numbers<[1], [0], [0], [1], [0, 0, 1, 1], [], []>} : vector<256x72xbf16>, vector<72x72xbf16>, vector<256x72xf32> -> vector<256x72xf32>
    %cst_10 = arith.constant 0.000000e+00 : f32
    %19 = vector.broadcast %cst_10 : f32 to vector<256x72xf32>
    %20 = arith.maximumf %18, %19 : vector<256x72xf32>
    %21 = arith.truncf %20 : vector<256x72xf32> to vector<256x72xbf16>
    %c2 = arith.constant 2 : index
    %c0_11 = arith.constant 0 : index
    %c0_12 = arith.constant 0 : index
    %22 = vector.load %arg2[%c2, %c0_11, %c0_12] : memref<8x72x72xbf16, #tpu.memory_space<vmem>>, vector<1x72x72xbf16>
    %23 = vector.shape_cast %22 : vector<1x72x72xbf16> to vector<72x72xbf16>
    %cst_13 = arith.constant dense<0.000000e+00> : vector<256x72xf32>
    %24 = tpu.matmul %21, %23, %cst_13 {dimension_numbers = #tpu.dot_dimension_numbers<[1], [0], [0], [1], [0, 0, 1, 1], [], []>} : vector<256x72xbf16>, vector<72x72xbf16>, vector<256x72xf32> -> vector<256x72xf32>
    %cst_14 = arith.constant 0.000000e+00 : f32
    %25 = vector.broadcast %cst_14 : f32 to vector<256x72xf32>
    %26 = arith.maximumf %24, %25 : vector<256x72xf32>
    %27 = arith.truncf %26 : vector<256x72xf32> to vector<256x72xbf16>
    %c3 = arith.constant 3 : index
    %c0_15 = arith.constant 0 : index
    %c0_16 = arith.constant 0 : index
    %28 = vector.load %arg2[%c3, %c0_15, %c0_16] : memref<8x72x72xbf16, #tpu.memory_space<vmem>>, vector<1x72x72xbf16>
    %29 = vector.shape_cast %28 : vector<1x72x72xbf16> to vector<72x72xbf16>
    %cst_17 = arith.constant dense<0.000000e+00> : vector<256x72xf32>
    %30 = tpu.matmul %27, %29, %cst_17 {dimension_numbers = #tpu.dot_dimension_numbers<[1], [0], [0], [1], [0, 0, 1, 1], [], []>} : vector<256x72xbf16>, vector<72x72xbf16>, vector<256x72xf32> -> vector<256x72xf32>
    %cst_18 = arith.constant 0.000000e+00 : f32
    %31 = vector.broadcast %cst_18 : f32 to vector<256x72xf32>
    %32 = arith.maximumf %30, %31 : vector<256x72xf32>
    %33 = arith.truncf %32 : vector<256x72xf32> to vector<256x72xbf16>
    %c4 = arith.constant 4 : index
    %c0_19 = arith.constant 0 : index
    %c0_20 = arith.constant 0 : index
    %34 = vector.load %arg2[%c4, %c0_19, %c0_20] : memref<8x72x72xbf16, #tpu.memory_space<vmem>>, vector<1x72x72xbf16>
    %35 = vector.shape_cast %34 : vector<1x72x72xbf16> to vector<72x72xbf16>
    %cst_21 = arith.constant dense<0.000000e+00> : vector<256x72xf32>
    %36 = tpu.matmul %33, %35, %cst_21 {dimension_numbers = #tpu.dot_dimension_numbers<[1], [0], [0], [1], [0, 0, 1, 1], [], []>} : vector<256x72xbf16>, vector<72x72xbf16>, vector<256x72xf32> -> vector<256x72xf32>
    %cst_22 = arith.constant 0.000000e+00 : f32
    %37 = vector.broadcast %cst_22 : f32 to vector<256x72xf32>
    %38 = arith.maximumf %36, %37 : vector<256x72xf32>
    %39 = arith.truncf %38 : vector<256x72xf32> to vector<256x72xbf16>
    %c5 = arith.constant 5 : index
    %c0_23 = arith.constant 0 : index
    %c0_24 = arith.constant 0 : index
    %40 = vector.load %arg2[%c5, %c0_23, %c0_24] : memref<8x72x72xbf16, #tpu.memory_space<vmem>>, vector<1x72x72xbf16>
    %41 = vector.shape_cast %40 : vector<1x72x72xbf16> to vector<72x72xbf16>
    %cst_25 = arith.constant dense<0.000000e+00> : vector<256x72xf32>
    %42 = tpu.matmul %39, %41, %cst_25 {dimension_numbers = #tpu.dot_dimension_numbers<[1], [0], [0], [1], [0, 0, 1, 1], [], []>} : vector<256x72xbf16>, vector<72x72xbf16>, vector<256x72xf32> -> vector<256x72xf32>
    %cst_26 = arith.constant 0.000000e+00 : f32
    %43 = vector.broadcast %cst_26 : f32 to vector<256x72xf32>
    %44 = arith.maximumf %42, %43 : vector<256x72xf32>
    %45 = arith.truncf %44 : vector<256x72xf32> to vector<256x72xbf16>
    %c6 = arith.constant 6 : index
    %c0_27 = arith.constant 0 : index
    %c0_28 = arith.constant 0 : index
    %46 = vector.load %arg2[%c6, %c0_27, %c0_28] : memref<8x72x72xbf16, #tpu.memory_space<vmem>>, vector<1x72x72xbf16>
    %47 = vector.shape_cast %46 : vector<1x72x72xbf16> to vector<72x72xbf16>
    %cst_29 = arith.constant dense<0.000000e+00> : vector<256x72xf32>
    %48 = tpu.matmul %45, %47, %cst_29 {dimension_numbers = #tpu.dot_dimension_numbers<[1], [0], [0], [1], [0, 0, 1, 1], [], []>} : vector<256x72xbf16>, vector<72x72xbf16>, vector<256x72xf32> -> vector<256x72xf32>
    %cst_30 = arith.constant 0.000000e+00 : f32
    %49 = vector.broadcast %cst_30 : f32 to vector<256x72xf32>
    %50 = arith.maximumf %48, %49 : vector<256x72xf32>
    %51 = arith.truncf %50 : vector<256x72xf32> to vector<256x72xbf16>
    %c7 = arith.constant 7 : index
    %c0_31 = arith.constant 0 : index
    %c0_32 = arith.constant 0 : index
    %52 = vector.load %arg2[%c7, %c0_31, %c0_32] : memref<8x72x72xbf16, #tpu.memory_space<vmem>>, vector<1x72x72xbf16>
    %53 = vector.shape_cast %52 : vector<1x72x72xbf16> to vector<72x72xbf16>
    %cst_33 = arith.constant dense<0.000000e+00> : vector<256x72xf32>
    %54 = tpu.matmul %51, %53, %cst_33 {dimension_numbers = #tpu.dot_dimension_numbers<[1], [0], [0], [1], [0, 0, 1, 1], [], []>} : vector<256x72xbf16>, vector<72x72xbf16>, vector<256x72xf32> -> vector<256x72xf32>
    %cst_34 = arith.constant 0.000000e+00 : f32
    %55 = vector.broadcast %cst_34 : f32 to vector<256x72xf32>
    %56 = arith.maximumf %54, %55 : vector<256x72xf32>
    %57 = arith.truncf %56 : vector<256x72xf32> to vector<256x72xbf16>
    %58 = vector.extract_strided_slice %57 {offsets = [0, 0], sizes = [256, 32], strides = [1, 1]} : vector<256x72xbf16> to vector<256x32xbf16>
    %59 = arith.extf %58 : vector<256x32xbf16> to vector<256x32xf32>
    %60 = arith.index_cast %4 : i32 to index
    %c0_35 = arith.constant 0 : index
    %61 = vector.load %arg4[%60, %c0_35] : memref<256x32xf32, #tpu.memory_space<vmem>>, vector<256x32xf32>
    tpu.vector_store %arg4[%60, %c0_35], %59 {strides = array<i32>} : memref<256x32xf32, #tpu.memory_space<vmem>>, vector<256x32xf32>,
    %c1_i32_36 = arith.constant 1 : i32
    return
  }
  func.func @transform_0(%arg0: i32) -> (i32, i32) {
    %c0_i32 = arith.constant 0 : i32
    %c0_i32_0 = arith.constant 0 : i32
    return %arg0, %c0_i32 : i32, i32
  }
  func.func @transform_1(%arg0: i32) -> (i32, i32, i32) {
    %c0_i32 = arith.constant 0 : i32
    %c0_i32_0 = arith.constant 0 : i32
    %c0_i32_1 = arith.constant 0 : i32
    %c0_i32_2 = arith.constant 0 : i32
    return %c0_i32, %c0_i32_0, %c0_i32_1 : i32, i32, i32
  }
  func.func @transform_2(%arg0: i32) -> (i32, i32) {
    %c0_i32 = arith.constant 0 : i32
    %c0_i32_0 = arith.constant 0 : i32
    %c0_i32_1 = arith.constant 0 : i32
    return %c0_i32, %c0_i32_0 : i32, i32
  }
  func.func @transform_3(%arg0: i32) -> (i32, i32) {
    %c0_i32 = arith.constant 0 : i32
    %c0_i32_0 = arith.constant 0 : i32
    return %arg0, %c0_i32 : i32, i32
  }
}

</mosaic_0001>

<bundles_post_ra>
// kernel: tpu_custom_call.1
= control target key start
LH: loop header
LB: loop body
LE: loop exit
PB: predicated region body
PF: predicated region fallthrough
CT: control target
= control target key end

     0   :  { %vm84_vm0 = vcmask 261120   ;;  %vm428_vm1 = vcmask 1043456   ;;  %vm379_vm2 = vcmask 588800   ;;  %s3793_s1 = inlined_call_operand.vmem [shape: bf16[8,72,72], index: 1, kind: input, shape index: {}]   ;;  %s3794_s0 = inlined_call_operand.vmem [shape: f32[256,32], index: 0, kind: input, shape index: {}]   ;;  %s3795_s2 = inlined_call_operand.vmem [shape: f32[8,72], index: 2, kind: input, shape index: {}]   ;;  %s3796_s3 = inlined_call_operand.vmem [shape: f32[256,32], index: 3, kind: output, shape index: {}]  }
   0x1   :  { %v3222_v0 = vld [vmem:[%s3793_s1] sm:$0xff]   ;;  %v3223_v1 = vld [vmem:[%s3793_s1 + $0x8] sm:$0xff]   ;;  %v18_v5 = vld [vmem:[%s3794_s0 + $0x10] sm:$0xff] }
   0x2   :  { %2885 = vmatprep.subr.bf16.mxu0 %v3222_v0  ;;  %v16_v2 = vld [vmem:[%s3794_s0] sm:$0xff]  ;;  %v17_v3 = vld [vmem:[%s3794_s0 + $0x8] sm:$0xff]  ;;  %v19_v6 = vld [vmem:[%s3794_s0 + $0x18] sm:$0xff] }
   0x3   :  { %2886 = vmatpush3.bf16.msra.mxu0 %v3222_v0  ;;  %v48_v4 = vpack.c.bf16 %v17_v3, %v16_v2  ;;  %v20_v7 = vld [vmem:[%s3794_s0 + $0x20] sm:$0xff]  ;;  %v21_v8 = vld [vmem:[%s3794_s0 + $0x28] sm:$0xff]  ;;  %v49_v9 = vpack.c.bf16 %v19_v6, %v18_v5  ;;  %v22_v11 = vld [vmem:[%s3794_s0 + $0x30] sm:$0xff] }
   0x4   :  { %2887 = vmatprep.subr.bf16.mxu0 %v3223_v1  ;;  %v50_v10 = vpack.c.bf16 %v21_v8, %v20_v7  ;;  %v23_v12 = vld [vmem:[%s3794_s0 + $0x38] sm:$0xff]  ;;  %v24_v13 = vld [vmem:[%s3794_s0 + $0x40] sm:$0xff]  ;;  %v25_v14 = vld [vmem:[%s3794_s0 + $0x48] sm:$0xff] }
   0x5   :  { %2889 = vmatprep.mubr.msk.bf16.mxu0 %vm84_vm0, %v48_v4  ;;  %v3224_v15 = vld [vmem:[%s3793_s1 + $0x24] sm:$0xff]   ;;  %v51_v16 = vpack.c.bf16 %v23_v12, %v22_v11  ;;  %v3225_v17 = vld [vmem:[%s3793_s1 + $0x2c] sm:$0xff]   ;;  %v52_v18 = vpack.c.bf16 %v25_v14, %v24_v13  ;;  %v3226_v19 = vld [vmem:[%s3793_s1 + $0x34] sm:$0xff]  }
   0x6   :  { %2921 = vmatprep.subr.bf16.mxu1 %v3224_v15  ;;  %v26_v20 = vld [vmem:[%s3794_s0 + $0x50] sm:$0xff]  ;;  %v27_v21 = vld [vmem:[%s3794_s0 + $0x58] sm:$0xff]  ;;  %v28_v22 = vld [vmem:[%s3794_s0 + $0x60] sm:$0xff] }
   0x7   :  { %2888 = vmatpush3.bf16.msra.mxu0 %v3223_v1  ;;  %2922 = vmatpush3.bf16.msra.mxu1 %v3224_v15  ;;  %v29_v23 = vld [vmem:[%s3794_s0 + $0x68] sm:$0xff]  ;;  %v53_v24 = vpack.c.bf16 %v27_v21, %v26_v20  ;;  %v30_v26 = vld [vmem:[%s3794_s0 + $0x70] sm:$0xff]  ;;  %v31_v27 = vld [vmem:[%s3794_s0 + $0x78] sm:$0xff] }
   0x8   :  { %2923 = vmatprep.subr.bf16.mxu1 %v3225_v17  ;;  %v54_v25 = vpack.c.bf16 %v29_v23, %v28_v22  ;;  %v32_v28 = vld [vmem:[%s3794_s0 + $0x80] sm:$0xff]  ;;  %v33_v29 = vld [vmem:[%s3794_s0 + $0x88] sm:$0xff]  ;;  %v55_v30 = vpack.c.bf16 %v31_v27, %v30_v26  ;;  %v34_v32 = vld [vmem:[%s3794_s0 + $0x90] sm:$0xff] }
   0x9   :  { %v56_v31 = vpack.c.bf16 %v33_v29, %v32_v28  ;;  %v35_v33 = vld [vmem:[%s3794_s0 + $0x98] sm:$0xff]  ;;  %v36_v34 = vld [vmem:[%s3794_s0 + $0xa0] sm:$0xff]  ;;  %v37_v35 = vld [vmem:[%s3794_s0 + $0xa8] sm:$0xff] }
   0xa   :  { %2890 = vmatmul.mubr.msk.bf16.vlgmr.msra.gmra.mrb[0].mxu0 %vm84_vm0, %v49_v9  ;;  %v57_v36 = vpack.c.bf16 %v35_v33, %v34_v32  ;;  %v58_v37 = vpack.c.bf16 %v37_v35, %v36_v34  ;;  %v38_v38 = vld [vmem:[%s3794_s0 + $0xb0] sm:$0xff]  ;;  %v39_v39 = vld [vmem:[%s3794_s0 + $0xb8] sm:$0xff]  ;;  %v40_v40 = vld [vmem:[%s3794_s0 + $0xc0] sm:$0xff] }
   0xb   :  { %2893 = vmatprep.mubr.msk.bf16.mxu0 %vm84_vm0, %v50_v10  ;;  %2924 = vmatpush3.bf16.msra.mxu1 %v3225_v17  ;;  %v41_v41 = vld [vmem:[%s3794_s0 + $0xc8] sm:$0xff]  ;;  %v59_v42 = vpack.c.bf16 %v39_v39, %v38_v38  ;;  %v42_v44 = vld [vmem:[%s3794_s0 + $0xd0] sm:$0xff]  ;;  %v43_v45 = vld [vmem:[%s3794_s0 + $0xd8] sm:$0xff] }
   0xc   :  { %2925 = vmatprep.subr.bf16.mxu1 %v3226_v19  ;;  %v60_v43 = vpack.c.bf16 %v41_v41, %v40_v40  ;;  %v44_v46 = vld [vmem:[%s3794_s0 + $0xe0] sm:$0xff]  ;;  %v45_v47 = vld [vmem:[%s3794_s0 + $0xe8] sm:$0xff]  ;;  %v61_v48 = vpack.c.bf16 %v43_v45, %v42_v44  ;;  %v46_v50 = vld [vmem:[%s3794_s0 + $0xf0] sm:$0xff] }
   0xd   :  { %v62_v49 = vpack.c.bf16 %v45_v47, %v44_v46  ;;  %v47_v51 = vld [vmem:[%s3794_s0 + $0xf8] sm:$0xff]  ;;  %v3228_v54 = vld [vmem:[%s3793_s1 + $0x44] ss:$0 sps:$4 sm:$0xff]   ;;  %v3229_v56 = vld [vmem:[%s3793_s1 + $0x48] sm:$0xff]  }
   0xe   :  { %v63_v52 = vpack.c.bf16 %v47_v51, %v46_v50  ;;  %v3227_v53 = vld [vmem:[%s3793_s1 + $0x3c] sm:$0xff]   ;;  %v430_v55 = vsel %vm428_vm1, %v3228_v54, 0  ;;  %v3230_v57 = vld [vmem:[%s3793_s1 + $0x50] sm:$0xff]   ;;  %2963 = vmatprep.subr.bf16.mxu0 %v3229_v56  ;;  %v3233_v60 = vld [vmem:[%s3793_s1 + $0x68] ss:$0 sps:$4 sm:$0xff]  }
   0xf   :  { %2926 = vmatpush3.bf16.msra.mxu1 %v3226_v19  ;;  %2964 = vmatpush3.bf16.msra.mxu0 %v3229_v56  ;;  %v3231_v58 = vld [vmem:[%s3793_s1 + $0x58] sm:$0xff]   ;;  %v3232_v59 = vld [vmem:[%s3793_s1 + $0x60] sm:$0xff]   ;;  %v727_v61 = vsel %vm428_vm1, %v3233_v60, 0 }
  0x10   :  { %2927 = vmatprep.subr.bf16.mxu1 %v3227_v53  ;;  %2965 = vmatprep.subr.bf16.mxu0 %v3230_v57  ;;  %v3434_v62 = vld [vmem:[%s3795_s2] ss:$0 sm:$0xff] }
  0x12   :  { %2894 = vmatmul.mubr.msk.bf16.gmra.mrb[4].mxu0 %vm84_vm0, %v51_v16 }
  0x13   :  { %2897 = vmatprep.mubr.msk.bf16.mxu0 %vm84_vm0, %v52_v18  ;;  %2928 = vmatpush3.bf16.msra.mxu1 %v3227_v53 }
  0x14   :  { %3215 = vmatprep.subr.msk.bf16.mxu1 %vm428_vm1, %v3228_v54  ;;  %2966 = vmatpush3.bf16.msra.mxu0 %v3230_v57 }
  0x15   :  { %2967 = vmatprep.subr.bf16.mxu0 %v3231_v58 }
  0x17   :  { %2930 = vmatpush3.bf16.msra.mxu1 %v430_v55 }
  0x18   :  { %2968 = vmatpush3.bf16.msra.mxu0 %v3231_v58 }
  0x19   :  { %2969 = vmatprep.subr.bf16.mxu0 %v3232_v59 }
  0x1a   :  { %2898 = vmatmul.mubr.msk.bf16.gmra.mrb[8].mxu0 %vm84_vm0, %v53_v24 }
  0x1b   :  { %2901 = vmatprep.mubr.msk.bf16.mxu0 %vm84_vm0, %v54_v25 }
  0x1c   :  { %2970 = vmatpush3.bf16.msra.mxu0 %v3232_v59 }
  0x1d   :  { %3216 = vmatprep.subr.msk.bf16.mxu0 %vm428_vm1, %v3233_v60 }
  0x20   :  { %2972 = vmatpush3.bf16.msra.mxu0 %v727_v61 }
  0x22   :  { %2902 = vmatmul.mubr.msk.bf16.gmra.mrb[12].mxu0 %vm84_vm0, %v55_v30 }
  0x23   :  { %2905 = vmatprep.mubr.msk.bf16.mxu0 %vm84_vm0, %v56_v31 }
  0x2a   :  { %2906 = vmatmul.mubr.msk.bf16.gmra.mrb[16].mxu0 %vm84_vm0, %v57_v36 }
  0x2b   :  { %2909 = vmatprep.mubr.msk.bf16.mxu0 %vm84_vm0, %v58_v37 }
  0x32   :  { %2910 = vmatmul.mubr.msk.bf16.gmra.mrb[20].mxu0 %vm84_vm0, %v59_v42 }
  0x33   :  { %2913 = vmatprep.mubr.msk.bf16.mxu0 %vm84_vm0, %v60_v43 }
  0x3a   :  { %2914 = vmatmul.mubr.msk.bf16.gmra.mrb[24].mxu0 %vm84_vm0, %v61_v48 }
  0x3b   :  { %2917 = vmatprep.mubr.msk.bf16.mxu0 %vm84_vm0, %v62_v49 }
  0x42   :  { %2918 = vmatmul.mubr.msk.bf16.gmra.mrb[28].mxu0 %vm84_vm0, %v63_v52 }
  0xdd   :  { %v2891_v63 = vpop.f32.mrb[0].mxu0 }
  0xde   :  { %v176_v0 = vadd.f32 %v2891_v63, %v3434_v62  ;;  %v167_v1 = vpop.f32.mrb[1].mxu0 }
  0xdf   :  { %v168_v2 = vadd.f32 %v3434_v62, %v167_v1  ;;  %v2892_v3 = vpop.f32.mrb[2].mxu0 }
  0xe0   :  { %v179_v4 = vadd.f32 %v2892_v3, %v3434_v62  ;;  %v170_v5 = vpop.f32.mrb[3].mxu0  ;;  %v296_v7 = vmax.f32 %v176_v0, 0.0 }
  0xe1   :  { %v171_v6 = vadd.f32 %v3434_v62, %v170_v5  ;;  %v294_v9 = vmax.f32 %v168_v2, 0.0 }
  0xe2   :  { %v297_v8 = vmax.f32 %v179_v4, 0.0 }
  0xe3   :  { %v295_v10 = vmax.f32 %v171_v6, 0.0 }
  0xe4   :  { %v327_v11 = vpack.c.bf16 %v297_v8, %v296_v7 }
  0xe5   :  { %v2895_v12 = vpop.f32.mrb[4].mxu0  ;;  %v326_v13 = vpack.c.bf16 %v295_v10, %v294_v9 }
  0xe6   :  { %v192_v14 = vadd.f32 %v2895_v12, %v3434_v62  ;;  %v183_v15 = vpop.f32.mrb[5].mxu0 }
  0xe7   :  { %v184_v16 = vadd.f32 %v3434_v62, %v183_v15  ;;  %v2896_v17 = vpop.f32.mrb[6].mxu0  ;;  %2931 = vmatprep.mubr.msk.bf16.mxu1 %vm379_vm2, %v326_v13 }
  0xe8   :  { %v195_v18 = vadd.f32 %v2896_v17, %v3434_v62  ;;  %v186_v19 = vpop.f32.mrb[7].mxu0  ;;  %2932 = vmatmul.mubr.msk.bf16.vlgmr.msra.gmra.mrb[0].mxu1 %vm379_vm2, %v327_v11  ;;  %v300_v21 = vmax.f32 %v192_v14, 0.0 }
  0xe9   :  { %v187_v20 = vadd.f32 %v3434_v62, %v186_v19  ;;  %v298_v23 = vmax.f32 %v184_v16, 0.0 }
  0xea   :  { %v301_v22 = vmax.f32 %v195_v18, 0.0 }
  0xeb   :  { %v299_v24 = vmax.f32 %v187_v20, 0.0 }
  0xec   :  { %v329_v25 = vpack.c.bf16 %v301_v22, %v300_v21 }
  0xed   :  { %v328_v26 = vpack.c.bf16 %v299_v24, %v298_v23  ;;  %v2899_v27 = vpop.f32.mrb[8].mxu0 }
  0xee   :  { %v208_v28 = vadd.f32 %v2899_v27, %v3434_v62  ;;  %v199_v29 = vpop.f32.mrb[9].mxu0 }
  0xef   :  { %v200_v30 = vadd.f32 %v3434_v62, %v199_v29  ;;  %v2900_v31 = vpop.f32.mrb[10].mxu0  ;;  %2935 = vmatprep.mubr.msk.bf16.mxu1 %vm379_vm2, %v328_v26 }
  0xf0   :  { %v211_v32 = vadd.f32 %v2900_v31, %v3434_v62  ;;  %v202_v33 = vpop.f32.mrb[11].mxu0  ;;  %2936 = vmatmul.mubr.msk.bf16.gmra.mrb[4].mxu1 %vm379_vm2, %v329_v25  ;;  %v304_v35 = vmax.f32 %v208_v28, 0.0 }
  0xf1   :  { %v203_v34 = vadd.f32 %v3434_v62, %v202_v33  ;;  %v302_v37 = vmax.f32 %v200_v30, 0.0 }
  0xf2   :  { %v305_v36 = vmax.f32 %v211_v32, 0.0 }
  0xf3   :  { %v303_v38 = vmax.f32 %v203_v34, 0.0 }
  0xf4   :  { %v331_v39 = vpack.c.bf16 %v305_v36, %v304_v35 }
  0xf5   :  { %v330_v40 = vpack.c.bf16 %v303_v38, %v302_v37  ;;  %v2903_v41 = vpop.f32.mrb[12].mxu0 }
  0xf6   :  { %v224_v42 = vadd.f32 %v2903_v41, %v3434_v62  ;;  %v215_v43 = vpop.f32.mrb[13].mxu0 }
  0xf7   :  { %v216_v44 = vadd.f32 %v3434_v62, %v215_v43  ;;  %v2904_v45 = vpop.f32.mrb[14].mxu0  ;;  %2939 = vmatprep.mubr.msk.bf16.mxu1 %vm379_vm2, %v330_v40 }
  0xf8   :  { %v227_v46 = vadd.f32 %v2904_v45, %v3434_v62  ;;  %v218_v47 = vpop.f32.mrb[15].mxu0  ;;  %2940 = vmatmul.mubr.msk.bf16.gmra.mrb[8].mxu1 %vm379_vm2, %v331_v39  ;;  %v308_v49 = vmax.f32 %v224_v42, 0.0 }
  0xf9   :  { %v219_v48 = vadd.f32 %v3434_v62, %v218_v47  ;;  %v306_v51 = vmax.f32 %v216_v44, 0.0 }
  0xfa   :  { %v309_v50 = vmax.f32 %v227_v46, 0.0 }
  0xfb   :  { %v307_v52 = vmax.f32 %v219_v48, 0.0  ;;  %v3234_v48 = vld [vmem:[%s3793_s1 + $0x6c] sm:$0xff]  }
  0xfc   :  { %v333_v53 = vpack.c.bf16 %v309_v50, %v308_v49  ;;  %v3235_v49 = vld [vmem:[%s3793_s1 + $0x74] sm:$0xff]   ;;  %3005 = vmatprep.subr.bf16.mxu1 %v3234_v48  ;;  %v3237_v50 = vld [vmem:[%s3793_s1 + $0x84] sm:$0xff]  }
  0xfd   :  { %v332_v54 = vpack.c.bf16 %v307_v52, %v306_v51  ;;  %v2907_v55 = vpop.f32.mrb[16].mxu0  ;;  %3006 = vmatpush3.bf16.msra.mxu1 %v3234_v48  ;;  %v3238_v51 = vld [vmem:[%s3793_s1 + $0x8c] ss:$0 sps:$4 sm:$0xff]  }
  0xfe   :  { %v240_v56 = vadd.f32 %v2907_v55, %v3434_v62  ;;  %v231_v57 = vpop.f32.mrb[17].mxu0  ;;  %3007 = vmatprep.subr.bf16.mxu1 %v3235_v49  ;;  %v1024_v52 = vsel %vm428_vm1, %v3238_v51, 0 }
  0xff   :  { %v232_v58 = vadd.f32 %v3434_v62, %v231_v57  ;;  %v2908_v59 = vpop.f32.mrb[18].mxu0  ;;  %2943 = vmatprep.mubr.msk.bf16.mxu1 %vm379_vm2, %v332_v54 }
 0x100   :  { %v243_v60 = vadd.f32 %v2908_v59, %v3434_v62  ;;  %v234_v61 = vpop.f32.mrb[19].mxu0  ;;  %2944 = vmatmul.mubr.msk.bf16.gmra.mrb[12].mxu1 %vm379_vm2, %v333_v53  ;;  %v312_v0 = vmax.f32 %v240_v56, 0.0 }
 0x101   :  { %v235_v63 = vadd.f32 %v3434_v62, %v234_v61  ;;  %v310_v2 = vmax.f32 %v232_v58, 0.0  ;;  %3008 = vmatpush3.bf16.msra.mxu1 %v3235_v49 }
 0x102   :  { %v313_v1 = vmax.f32 %v243_v60, 0.0 }
 0x103   :  { %v311_v3 = vmax.f32 %v235_v63, 0.0 }
 0x104   :  { %v335_v4 = vpack.c.bf16 %v313_v1, %v312_v0 }
 0x105   :  { %v334_v5 = vpack.c.bf16 %v311_v3, %v310_v2  ;;  %v2911_v6 = vpop.f32.mrb[20].mxu0 }
 0x106   :  { %v256_v7 = vadd.f32 %v2911_v6, %v3434_v62  ;;  %v247_v8 = vpop.f32.mrb[21].mxu0 }
 0x107   :  { %v248_v9 = vadd.f32 %v3434_v62, %v247_v8  ;;  %v2912_v10 = vpop.f32.mrb[22].mxu0  ;;  %2947 = vmatprep.mubr.msk.bf16.mxu1 %vm379_vm2, %v334_v5 }
 0x108   :  { %v259_v11 = vadd.f32 %v2912_v10, %v3434_v62  ;;  %v250_v12 = vpop.f32.mrb[23].mxu0  ;;  %2948 = vmatmul.mubr.msk.bf16.gmra.mrb[16].mxu1 %vm379_vm2, %v335_v4  ;;  %v316_v14 = vmax.f32 %v256_v7, 0.0 }
 0x109   :  { %v251_v13 = vadd.f32 %v3434_v62, %v250_v12  ;;  %v314_v16 = vmax.f32 %v248_v9, 0.0 }
 0x10a   :  { %v317_v15 = vmax.f32 %v259_v11, 0.0 }
 0x10b   :  { %v315_v17 = vmax.f32 %v251_v13, 0.0 }
 0x10c   :  { %v337_v18 = vpack.c.bf16 %v317_v15, %v316_v14 }
 0x10d   :  { %v336_v19 = vpack.c.bf16 %v315_v17, %v314_v16  ;;  %v2915_v20 = vpop.f32.mrb[24].mxu0 }
 0x10e   :  { %v272_v21 = vadd.f32 %v2915_v20, %v3434_v62  ;;  %v263_v22 = vpop.f32.mrb[25].mxu0 }
 0x10f   :  { %v264_v23 = vadd.f32 %v3434_v62, %v263_v22  ;;  %v2916_v24 = vpop.f32.mrb[26].mxu0  ;;  %2951 = vmatprep.mubr.msk.bf16.mxu1 %vm379_vm2, %v336_v19 }
 0x110   :  { %v275_v25 = vadd.f32 %v2916_v24, %v3434_v62  ;;  %v266_v26 = vpop.f32.mrb[27].mxu0  ;;  %2952 = vmatmul.mubr.msk.bf16.gmra.mrb[20].mxu1 %vm379_vm2, %v337_v18  ;;  %v320_v28 = vmax.f32 %v272_v21, 0.0 }
 0x111   :  { %v267_v27 = vadd.f32 %v3434_v62, %v266_v26  ;;  %v318_v30 = vmax.f32 %v264_v23, 0.0 }
 0x112   :  { %v321_v29 = vmax.f32 %v275_v25, 0.0 }
 0x113   :  { %v319_v31 = vmax.f32 %v267_v27, 0.0 }
 0x114   :  { %v339_v32 = vpack.c.bf16 %v321_v29, %v320_v28 }
 0x115   :  { %v338_v33 = vpack.c.bf16 %v319_v31, %v318_v30  ;;  %v2919_v34 = vpop.f32.mrb[28].mxu0 }
 0x116   :  { %v288_v35 = vadd.f32 %v2919_v34, %v3434_v62  ;;  %v279_v36 = vpop.f32.mrb[29].mxu0 }
 0x117   :  { %v280_v37 = vadd.f32 %v3434_v62, %v279_v36  ;;  %v2920_v38 = vpop.f32.mrb[30].mxu0  ;;  %2955 = vmatprep.mubr.msk.bf16.mxu1 %vm379_vm2, %v338_v33 }
 0x118   :  { %v291_v39 = vadd.f32 %v2920_v38, %v3434_v62  ;;  %v282_v40 = vpop.f32.mrb[31].mxu0  ;;  %2956 = vmatmul.mubr.msk.bf16.gmra.mrb[24].mxu1 %vm379_vm2, %v339_v32  ;;  %v324_v42 = vmax.f32 %v288_v35, 0.0 }
 0x119   :  { %v283_v41 = vadd.f32 %v3434_v62, %v282_v40  ;;  %v322_v44 = vmax.f32 %v280_v37, 0.0  ;;  %v3236_v62 = vld [vmem:[%s3793_s1 + $0x7c] sm:$0xff]  }
 0x11a   :  { %v325_v43 = vmax.f32 %v291_v39, 0.0  ;;  %3009 = vmatprep.subr.bf16.mxu1 %v3236_v62 }
 0x11b   :  { %v323_v45 = vmax.f32 %v283_v41, 0.0  ;;  %3010 = vmatpush3.bf16.msra.mxu1 %v3236_v62 }
 0x11c   :  { %v341_v46 = vpack.c.bf16 %v325_v43, %v324_v42  ;;  %3011 = vmatprep.subr.bf16.mxu1 %v3237_v50 }
 0x11d   :  { %v340_v47 = vpack.c.bf16 %v323_v45, %v322_v44 }
 0x11f   :  { %2959 = vmatprep.mubr.msk.bf16.mxu1 %vm379_vm2, %v340_v47  ;;  %3012 = vmatpush3.bf16.msra.mxu1 %v3237_v50 }
 0x120   :  { %2960 = vmatmul.mubr.msk.bf16.gmra.mrb[28].mxu1 %vm379_vm2, %v341_v46  ;;  %3217 = vmatprep.subr.msk.bf16.mxu1 %vm428_vm1, %v3238_v51 }
 0x123   :  { %3014 = vmatpush3.bf16.msra.mxu1 %v1024_v52 }
 0x1bb   :  { %v2933_v53 = vpop.f32.mrb[0].mxu1 }
 0x1bc   :  { %v466_v54 = vpop.f32.mrb[1].mxu1  ;;  %v595_v56 = vmax.f32 %v2933_v53, 0.0 }
 0x1bd   :  { %v2934_v55 = vpop.f32.mrb[2].mxu1  ;;  %v593_v59 = vmax.f32 %v466_v54, 0.0 }
 0x1be   :  { %v596_v57 = vmax.f32 %v2934_v55, 0.0  ;;  %v469_v58 = vpop.f32.mrb[3].mxu1 }
 0x1bf   :  { %v594_v60 = vmax.f32 %v469_v58, 0.0 }
 0x1c0   :  { %v626_v61 = vpack.c.bf16 %v596_v57, %v595_v56 }
 0x1c1   :  { %v625_v63 = vpack.c.bf16 %v594_v60, %v593_v59 }
 0x1c3   :  { %v2937_v0 = vpop.f32.mrb[4].mxu1  ;;  %2973 = vmatprep.mubr.msk.bf16.mxu0 %vm379_vm2, %v625_v63 }
 0x1c4   :  { %v482_v1 = vpop.f32.mrb[5].mxu1  ;;  %2974 = vmatmul.mubr.msk.bf16.vlgmr.msra.gmra.mrb[32].mxu0 %vm379_vm2, %v626_v61  ;;  %v599_v3 = vmax.f32 %v2937_v0, 0.0 }
 0x1c5   :  { %v2938_v2 = vpop.f32.mrb[6].mxu1  ;;  %v597_v6 = vmax.f32 %v482_v1, 0.0 }
 0x1c6   :  { %v600_v4 = vmax.f32 %v2938_v2, 0.0  ;;  %v485_v5 = vpop.f32.mrb[7].mxu1 }
 0x1c7   :  { %v598_v7 = vmax.f32 %v485_v5, 0.0 }
 0x1c8   :  { %v628_v8 = vpack.c.bf16 %v600_v4, %v599_v3 }
 0x1c9   :  { %v627_v9 = vpack.c.bf16 %v598_v7, %v597_v6  ;;  %v3239_v6 = vld [vmem:[%s3793_s1 + $0x90] sm:$0xff]   ;;  %v3240_v7 = vld [vmem:[%s3793_s1 + $0x98] sm:$0xff]  }
 0x1ca   :  { %3047 = vmatprep.subr.bf16.mxu0 %v3239_v6 }
 0x1cb   :  { %v2941_v10 = vpop.f32.mrb[8].mxu1  ;;  %2977 = vmatprep.mubr.msk.bf16.mxu0 %vm379_vm2, %v627_v9  ;;  %3048 = vmatpush3.bf16.msra.mxu0 %v3239_v6  ;;  %v3242_v9 = vld [vmem:[%s3793_s1 + $0xa8] sm:$0xff]  }
 0x1cc   :  { %v498_v11 = vpop.f32.mrb[9].mxu1  ;;  %2978 = vmatmul.mubr.msk.bf16.gmra.mrb[36].mxu0 %vm379_vm2, %v628_v8  ;;  %v603_v13 = vmax.f32 %v2941_v10, 0.0  ;;  %3049 = vmatprep.subr.bf16.mxu0 %v3240_v7  ;;  %v3241_v8 = vld [vmem:[%s3793_s1 + $0xa0] sm:$0xff]   ;;  %v3243_v10 = vld [vmem:[%s3793_s1 + $0xb0] ss:$0 sps:$4 sm:$0xff]  }
 0x1cd   :  { %v2942_v12 = vpop.f32.mrb[10].mxu1  ;;  %v601_v16 = vmax.f32 %v498_v11, 0.0  ;;  %v1321_v11 = vsel %vm428_vm1, %v3243_v10, 0 }
 0x1ce   :  { %v604_v14 = vmax.f32 %v2942_v12, 0.0  ;;  %v501_v15 = vpop.f32.mrb[11].mxu1 }
 0x1cf   :  { %v602_v17 = vmax.f32 %v501_v15, 0.0  ;;  %3050 = vmatpush3.bf16.msra.mxu0 %v3240_v7 }
 0x1d0   :  { %v630_v18 = vpack.c.bf16 %v604_v14, %v603_v13  ;;  %3051 = vmatprep.subr.bf16.mxu0 %v3241_v8 }
 0x1d1   :  { %v629_v19 = vpack.c.bf16 %v602_v17, %v601_v16 }
 0x1d3   :  { %v2945_v20 = vpop.f32.mrb[12].mxu1  ;;  %2981 = vmatprep.mubr.msk.bf16.mxu0 %vm379_vm2, %v629_v19  ;;  %3052 = vmatpush3.bf16.msra.mxu0 %v3241_v8 }
 0x1d4   :  { %v514_v21 = vpop.f32.mrb[13].mxu1  ;;  %2982 = vmatmul.mubr.msk.bf16.gmra.mrb[40].mxu0 %vm379_vm2, %v630_v18  ;;  %v607_v23 = vmax.f32 %v2945_v20, 0.0  ;;  %3053 = vmatprep.subr.bf16.mxu0 %v3242_v9 }
 0x1d5   :  { %v2946_v22 = vpop.f32.mrb[14].mxu1  ;;  %v605_v26 = vmax.f32 %v514_v21, 0.0 }
 0x1d6   :  { %v608_v24 = vmax.f32 %v2946_v22, 0.0  ;;  %v517_v25 = vpop.f32.mrb[15].mxu1 }
 0x1d7   :  { %v606_v27 = vmax.f32 %v517_v25, 0.0  ;;  %3054 = vmatpush3.bf16.msra.mxu0 %v3242_v9 }
 0x1d8   :  { %v632_v28 = vpack.c.bf16 %v608_v24, %v607_v23  ;;  %3218 = vmatprep.subr.msk.bf16.mxu0 %vm428_vm1, %v3243_v10 }
 0x1d9   :  { %v631_v29 = vpack.c.bf16 %v606_v27, %v605_v26 }
 0x1db   :  { %v2949_v30 = vpop.f32.mrb[16].mxu1  ;;  %2985 = vmatprep.mubr.msk.bf16.mxu0 %vm379_vm2, %v631_v29  ;;  %3056 = vmatpush3.bf16.msra.mxu0 %v1321_v11 }
 0x1dc   :  { %v530_v31 = vpop.f32.mrb[17].mxu1  ;;  %2986 = vmatmul.mubr.msk.bf16.gmra.mrb[44].mxu0 %vm379_vm2, %v632_v28  ;;  %v611_v33 = vmax.f32 %v2949_v30, 0.0 }
 0x1dd   :  { %v2950_v32 = vpop.f32.mrb[18].mxu1  ;;  %v609_v36 = vmax.f32 %v530_v31, 0.0 }
 0x1de   :  { %v612_v34 = vmax.f32 %v2950_v32, 0.0  ;;  %v533_v35 = vpop.f32.mrb[19].mxu1 }
 0x1df   :  { %v610_v37 = vmax.f32 %v533_v35, 0.0 }
 0x1e0   :  { %v634_v38 = vpack.c.bf16 %v612_v34, %v611_v33 }
 0x1e1   :  { %v633_v39 = vpack.c.bf16 %v610_v37, %v609_v36 }
 0x1e3   :  { %v2953_v40 = vpop.f32.mrb[20].mxu1  ;;  %2989 = vmatprep.mubr.msk.bf16.mxu0 %vm379_vm2, %v633_v39 }
 0x1e4   :  { %v546_v41 = vpop.f32.mrb[21].mxu1  ;;  %2990 = vmatmul.mubr.msk.bf16.gmra.mrb[48].mxu0 %vm379_vm2, %v634_v38  ;;  %v615_v43 = vmax.f32 %v2953_v40, 0.0 }
 0x1e5   :  { %v2954_v42 = vpop.f32.mrb[22].mxu1  ;;  %v613_v46 = vmax.f32 %v546_v41, 0.0 }
 0x1e6   :  { %v616_v44 = vmax.f32 %v2954_v42, 0.0  ;;  %v549_v45 = vpop.f32.mrb[23].mxu1 }
 0x1e7   :  { %v614_v47 = vmax.f32 %v549_v45, 0.0 }
 0x1e8   :  { %v636_v48 = vpack.c.bf16 %v616_v44, %v615_v43 }
 0x1e9   :  { %v635_v49 = vpack.c.bf16 %v614_v47, %v613_v46 }
 0x1eb   :  { %v2957_v62 = vpop.f32.mrb[24].mxu1  ;;  %2993 = vmatprep.mubr.msk.bf16.mxu0 %vm379_vm2, %v635_v49 }
 0x1ec   :  { %v562_v50 = vpop.f32.mrb[25].mxu1  ;;  %2994 = vmatmul.mubr.msk.bf16.gmra.mrb[52].mxu0 %vm379_vm2, %v636_v48  ;;  %v619_v52 = vmax.f32 %v2957_v62, 0.0 }
 0x1ed   :  { %v2958_v51 = vpop.f32.mrb[26].mxu1  ;;  %v617_v55 = vmax.f32 %v562_v50, 0.0 }
 0x1ee   :  { %v620_v53 = vmax.f32 %v2958_v51, 0.0  ;;  %v565_v54 = vpop.f32.mrb[27].mxu1 }
 0x1ef   :  { %v618_v56 = vmax.f32 %v565_v54, 0.0 }
 0x1f0   :  { %v638_v57 = vpack.c.bf16 %v620_v53, %v619_v52 }
 0x1f1   :  { %v637_v58 = vpack.c.bf16 %v618_v56, %v617_v55 }
 0x1f3   :  { %v2961_v59 = vpop.f32.mrb[28].mxu1  ;;  %2997 = vmatprep.mubr.msk.bf16.mxu0 %vm379_vm2, %v637_v58 }
 0x1f4   :  { %v578_v60 = vpop.f32.mrb[29].mxu1  ;;  %2998 = vmatmul.mubr.msk.bf16.gmra.mrb[56].mxu0 %vm379_vm2, %v638_v57  ;;  %v623_v63 = vmax.f32 %v2961_v59, 0.0 }
 0x1f5   :  { %v2962_v61 = vpop.f32.mrb[30].mxu1  ;;  %v621_v2 = vmax.f32 %v578_v60, 0.0 }
 0x1f6   :  { %v624_v0 = vmax.f32 %v2962_v61, 0.0  ;;  %v581_v1 = vpop.f32.mrb[31].mxu1 }
 0x1f7   :  { %v622_v3 = vmax.f32 %v581_v1, 0.0 }
 0x1f8   :  { %v640_v4 = vpack.c.bf16 %v624_v0, %v623_v63 }
 0x1f9   :  { %v639_v5 = vpack.c.bf16 %v622_v3, %v621_v2 }
 0x1fb   :  { %3001 = vmatprep.mubr.msk.bf16.mxu0 %vm379_vm2, %v639_v5 }
 0x1fc   :  { %3002 = vmatmul.mubr.msk.bf16.gmra.mrb[60].mxu0 %vm379_vm2, %v640_v4 }
 0x297   :  { %v2975_v12 = vpop.f32.mrb[32].mxu0 }
 0x298   :  { %v763_v13 = vpop.f32.mrb[33].mxu0  ;;  %v892_v15 = vmax.f32 %v2975_v12, 0.0 }
 0x299   :  { %v2976_v14 = vpop.f32.mrb[34].mxu0  ;;  %v890_v18 = vmax.f32 %v763_v13, 0.0 }
 0x29a   :  { %v893_v16 = vmax.f32 %v2976_v14, 0.0  ;;  %v766_v17 = vpop.f32.mrb[35].mxu0 }
 0x29b   :  { %v891_v19 = vmax.f32 %v766_v17, 0.0 }
 0x29c   :  { %v923_v20 = vpack.c.bf16 %v893_v16, %v892_v15 }
 0x29d   :  { %v922_v21 = vpack.c.bf16 %v891_v19, %v890_v18 }
 0x29f   :  { %v2979_v22 = vpop.f32.mrb[36].mxu0  ;;  %3015 = vmatprep.mubr.msk.bf16.mxu1 %vm379_vm2, %v922_v21 }
 0x2a0   :  { %v779_v23 = vpop.f32.mrb[37].mxu0  ;;  %3016 = vmatmul.mubr.msk.bf16.vlgmr.msra.gmra.mrb[32].mxu1 %vm379_vm2, %v923_v20  ;;  %v896_v25 = vmax.f32 %v2979_v22, 0.0 }
 0x2a1   :  { %v2980_v24 = vpop.f32.mrb[38].mxu0  ;;  %v894_v28 = vmax.f32 %v779_v23, 0.0 }
 0x2a2   :  { %v897_v26 = vmax.f32 %v2980_v24, 0.0  ;;  %v782_v27 = vpop.f32.mrb[39].mxu0 }
 0x2a3   :  { %v895_v29 = vmax.f32 %v782_v27, 0.0 }
 0x2a4   :  { %v925_v30 = vpack.c.bf16 %v897_v26, %v896_v25 }
 0x2a5   :  { %v924_v31 = vpack.c.bf16 %v895_v29, %v894_v28  ;;  %v3244_v28 = vld [vmem:[%s3793_s1 + $0xb4] sm:$0xff]   ;;  %v3245_v29 = vld [vmem:[%s3793_s1 + $0xbc] sm:$0xff]  }
 0x2a6   :  { %3089 = vmatprep.subr.bf16.mxu1 %v3244_v28 }
 0x2a7   :  { %v2983_v32 = vpop.f32.mrb[40].mxu0  ;;  %3019 = vmatprep.mubr.msk.bf16.mxu1 %vm379_vm2, %v924_v31  ;;  %3090 = vmatpush3.bf16.msra.mxu1 %v3244_v28  ;;  %v3247_v31 = vld [vmem:[%s3793_s1 + $0xcc] sm:$0xff]  }
 0x2a8   :  { %v795_v33 = vpop.f32.mrb[41].mxu0  ;;  %3020 = vmatmul.mubr.msk.bf16.gmra.mrb[36].mxu1 %vm379_vm2, %v925_v30  ;;  %v900_v35 = vmax.f32 %v2983_v32, 0.0  ;;  %3091 = vmatprep.subr.bf16.mxu1 %v3245_v29  ;;  %v3246_v30 = vld [vmem:[%s3793_s1 + $0xc4] sm:$0xff]   ;;  %v3248_v32 = vld [vmem:[%s3793_s1 + $0xd4] ss:$0 sps:$4 sm:$0xff]  }
 0x2a9   :  { %v2984_v34 = vpop.f32.mrb[42].mxu0  ;;  %v898_v38 = vmax.f32 %v795_v33, 0.0  ;;  %v1618_v33 = vsel %vm428_vm1, %v3248_v32, 0 }
 0x2aa   :  { %v901_v36 = vmax.f32 %v2984_v34, 0.0  ;;  %v798_v37 = vpop.f32.mrb[43].mxu0 }
 0x2ab   :  { %v899_v39 = vmax.f32 %v798_v37, 0.0  ;;  %3092 = vmatpush3.bf16.msra.mxu1 %v3245_v29 }
 0x2ac   :  { %v927_v40 = vpack.c.bf16 %v901_v36, %v900_v35  ;;  %3093 = vmatprep.subr.bf16.mxu1 %v3246_v30 }
 0x2ad   :  { %v926_v41 = vpack.c.bf16 %v899_v39, %v898_v38 }
 0x2af   :  { %v2987_v42 = vpop.f32.mrb[44].mxu0  ;;  %3023 = vmatprep.mubr.msk.bf16.mxu1 %vm379_vm2, %v926_v41  ;;  %3094 = vmatpush3.bf16.msra.mxu1 %v3246_v30 }
 0x2b0   :  { %v811_v43 = vpop.f32.mrb[45].mxu0  ;;  %3024 = vmatmul.mubr.msk.bf16.gmra.mrb[40].mxu1 %vm379_vm2, %v927_v40  ;;  %v904_v45 = vmax.f32 %v2987_v42, 0.0  ;;  %3095 = vmatprep.subr.bf16.mxu1 %v3247_v31 }
 0x2b1   :  { %v2988_v44 = vpop.f32.mrb[46].mxu0  ;;  %v902_v48 = vmax.f32 %v811_v43, 0.0 }
 0x2b2   :  { %v905_v46 = vmax.f32 %v2988_v44, 0.0  ;;  %v814_v47 = vpop.f32.mrb[47].mxu0 }
 0x2b3   :  { %v903_v49 = vmax.f32 %v814_v47, 0.0  ;;  %3096 = vmatpush3.bf16.msra.mxu1 %v3247_v31 }
 0x2b4   :  { %v929_v62 = vpack.c.bf16 %v905_v46, %v904_v45  ;;  %3219 = vmatprep.subr.msk.bf16.mxu1 %vm428_vm1, %v3248_v32 }
 0x2b5   :  { %v928_v50 = vpack.c.bf16 %v903_v49, %v902_v48 }
 0x2b7   :  { %v2991_v51 = vpop.f32.mrb[48].mxu0  ;;  %3027 = vmatprep.mubr.msk.bf16.mxu1 %vm379_vm2, %v928_v50  ;;  %3098 = vmatpush3.bf16.msra.mxu1 %v1618_v33 }
 0x2b8   :  { %v827_v52 = vpop.f32.mrb[49].mxu0  ;;  %3028 = vmatmul.mubr.msk.bf16.gmra.mrb[44].mxu1 %vm379_vm2, %v929_v62  ;;  %v908_v54 = vmax.f32 %v2991_v51, 0.0 }
 0x2b9   :  { %v2992_v53 = vpop.f32.mrb[50].mxu0  ;;  %v906_v57 = vmax.f32 %v827_v52, 0.0 }
 0x2ba   :  { %v909_v55 = vmax.f32 %v2992_v53, 0.0  ;;  %v830_v56 = vpop.f32.mrb[51].mxu0 }
 0x2bb   :  { %v907_v58 = vmax.f32 %v830_v56, 0.0 }
 0x2bc   :  { %v931_v59 = vpack.c.bf16 %v909_v55, %v908_v54 }
 0x2bd   :  { %v930_v60 = vpack.c.bf16 %v907_v58, %v906_v57 }
 0x2bf   :  { %v2995_v61 = vpop.f32.mrb[52].mxu0  ;;  %3031 = vmatprep.mubr.msk.bf16.mxu1 %vm379_vm2, %v930_v60 }
 0x2c0   :  { %v843_v63 = vpop.f32.mrb[53].mxu0  ;;  %3032 = vmatmul.mubr.msk.bf16.gmra.mrb[48].mxu1 %vm379_vm2, %v931_v59  ;;  %v912_v1 = vmax.f32 %v2995_v61, 0.0 }
 0x2c1   :  { %v2996_v0 = vpop.f32.mrb[54].mxu0  ;;  %v910_v4 = vmax.f32 %v843_v63, 0.0 }
 0x2c2   :  { %v913_v2 = vmax.f32 %v2996_v0, 0.0  ;;  %v846_v3 = vpop.f32.mrb[55].mxu0 }
 0x2c3   :  { %v911_v5 = vmax.f32 %v846_v3, 0.0 }
 0x2c4   :  { %v933_v6 = vpack.c.bf16 %v913_v2, %v912_v1 }
 0x2c5   :  { %v932_v7 = vpack.c.bf16 %v911_v5, %v910_v4 }
 0x2c7   :  { %v2999_v8 = vpop.f32.mrb[56].mxu0  ;;  %3035 = vmatprep.mubr.msk.bf16.mxu1 %vm379_vm2, %v932_v7 }
 0x2c8   :  { %v859_v9 = vpop.f32.mrb[57].mxu0  ;;  %3036 = vmatmul.mubr.msk.bf16.gmra.mrb[52].mxu1 %vm379_vm2, %v933_v6  ;;  %v916_v11 = vmax.f32 %v2999_v8, 0.0 }
 0x2c9   :  { %v3000_v10 = vpop.f32.mrb[58].mxu0  ;;  %v914_v14 = vmax.f32 %v859_v9, 0.0 }
 0x2ca   :  { %v917_v12 = vmax.f32 %v3000_v10, 0.0  ;;  %v862_v13 = vpop.f32.mrb[59].mxu0 }
 0x2cb   :  { %v915_v15 = vmax.f32 %v862_v13, 0.0 }
 0x2cc   :  { %v935_v16 = vpack.c.bf16 %v917_v12, %v916_v11 }
 0x2cd   :  { %v934_v17 = vpack.c.bf16 %v915_v15, %v914_v14 }
 0x2cf   :  { %v3003_v18 = vpop.f32.mrb[60].mxu0  ;;  %3039 = vmatprep.mubr.msk.bf16.mxu1 %vm379_vm2, %v934_v17 }
 0x2d0   :  { %v875_v19 = vpop.f32.mrb[61].mxu0  ;;  %3040 = vmatmul.mubr.msk.bf16.gmra.mrb[56].mxu1 %vm379_vm2, %v935_v16  ;;  %v920_v21 = vmax.f32 %v3003_v18, 0.0 }
 0x2d1   :  { %v3004_v20 = vpop.f32.mrb[62].mxu0  ;;  %v918_v24 = vmax.f32 %v875_v19, 0.0 }
 0x2d2   :  { %v921_v22 = vmax.f32 %v3004_v20, 0.0  ;;  %v878_v23 = vpop.f32.mrb[63].mxu0 }
 0x2d3   :  { %v919_v25 = vmax.f32 %v878_v23, 0.0 }
 0x2d4   :  { %v937_v26 = vpack.c.bf16 %v921_v22, %v920_v21 }
 0x2d5   :  { %v936_v27 = vpack.c.bf16 %v919_v25, %v918_v24 }
 0x2d7   :  { %3043 = vmatprep.mubr.msk.bf16.mxu1 %vm379_vm2, %v936_v27 }
 0x2d8   :  { %3044 = vmatmul.mubr.msk.bf16.gmra.mrb[60].mxu1 %vm379_vm2, %v937_v26 }
 0x373   :  { %v3017_v34 = vpop.f32.mrb[32].mxu1 }
 0x374   :  { %v1060_v35 = vpop.f32.mrb[33].mxu1  ;;  %v1189_v37 = vmax.f32 %v3017_v34, 0.0 }
 0x375   :  { %v3018_v36 = vpop.f32.mrb[34].mxu1  ;;  %v1187_v40 = vmax.f32 %v1060_v35, 0.0 }
 0x376   :  { %v1190_v38 = vmax.f32 %v3018_v36, 0.0  ;;  %v1063_v39 = vpop.f32.mrb[35].mxu1 }
 0x377   :  { %v1188_v41 = vmax.f32 %v1063_v39, 0.0 }
 0x378   :  { %v1220_v42 = vpack.c.bf16 %v1190_v38, %v1189_v37 }
 0x379   :  { %v1219_v43 = vpack.c.bf16 %v1188_v41, %v1187_v40 }
 0x37b   :  { %v3021_v44 = vpop.f32.mrb[36].mxu1  ;;  %3057 = vmatprep.mubr.msk.bf16.mxu0 %vm379_vm2, %v1219_v43 }
 0x37c   :  { %v1076_v45 = vpop.f32.mrb[37].mxu1  ;;  %3058 = vmatmul.mubr.msk.bf16.vlgmr.msra.gmra.mrb[64].mxu0 %vm379_vm2, %v1220_v42  ;;  %v1193_v47 = vmax.f32 %v3021_v44, 0.0 }
 0x37d   :  { %v3022_v46 = vpop.f32.mrb[38].mxu1  ;;  %v1191_v62 = vmax.f32 %v1076_v45, 0.0 }
 0x37e   :  { %v1194_v48 = vmax.f32 %v3022_v46, 0.0  ;;  %v1079_v49 = vpop.f32.mrb[39].mxu1 }
 0x37f   :  { %v1192_v50 = vmax.f32 %v1079_v49, 0.0 }
 0x380   :  { %v1222_v51 = vpack.c.bf16 %v1194_v48, %v1193_v47 }
 0x381   :  { %v1221_v52 = vpack.c.bf16 %v1192_v50, %v1191_v62  ;;  %v3249_v62 = vld [vmem:[%s3793_s1 + $0xd8] sm:$0xff]   ;;  %v3250_v50 = vld [vmem:[%s3793_s1 + $0xe0] sm:$0xff]  }
 0x382   :  { %3131 = vmatprep.subr.bf16.mxu0 %v3249_v62 }
 0x383   :  { %v3025_v53 = vpop.f32.mrb[40].mxu1  ;;  %3061 = vmatprep.mubr.msk.bf16.mxu0 %vm379_vm2, %v1221_v52  ;;  %3132 = vmatpush3.bf16.msra.mxu0 %v3249_v62  ;;  %v3252_v52 = vld [vmem:[%s3793_s1 + $0xf0] sm:$0xff]  }
 0x384   :  { %v1092_v54 = vpop.f32.mrb[41].mxu1  ;;  %3062 = vmatmul.mubr.msk.bf16.gmra.mrb[68].mxu0 %vm379_vm2, %v1222_v51  ;;  %v1197_v56 = vmax.f32 %v3025_v53, 0.0  ;;  %3133 = vmatprep.subr.bf16.mxu0 %v3250_v50  ;;  %v3251_v51 = vld [vmem:[%s3793_s1 + $0xe8] sm:$0xff]   ;;  %v3253_v53 = vld [vmem:[%s3793_s1 + $0xf8] ss:$0 sps:$4 sm:$0xff]  }
 0x385   :  { %v3026_v55 = vpop.f32.mrb[42].mxu1  ;;  %v1195_v59 = vmax.f32 %v1092_v54, 0.0  ;;  %v1915_v54 = vsel %vm428_vm1, %v3253_v53, 0 }
 0x386   :  { %v1198_v57 = vmax.f32 %v3026_v55, 0.0  ;;  %v1095_v58 = vpop.f32.mrb[43].mxu1 }
 0x387   :  { %v1196_v60 = vmax.f32 %v1095_v58, 0.0  ;;  %3134 = vmatpush3.bf16.msra.mxu0 %v3250_v50 }
 0x388   :  { %v1224_v61 = vpack.c.bf16 %v1198_v57, %v1197_v56  ;;  %3135 = vmatprep.subr.bf16.mxu0 %v3251_v51 }
 0x389   :  { %v1223_v63 = vpack.c.bf16 %v1196_v60, %v1195_v59 }
 0x38b   :  { %v3029_v0 = vpop.f32.mrb[44].mxu1  ;;  %3065 = vmatprep.mubr.msk.bf16.mxu0 %vm379_vm2, %v1223_v63  ;;  %3136 = vmatpush3.bf16.msra.mxu0 %v3251_v51 }
 0x38c   :  { %v1108_v1 = vpop.f32.mrb[45].mxu1  ;;  %3066 = vmatmul.mubr.msk.bf16.gmra.mrb[72].mxu0 %vm379_vm2, %v1224_v61  ;;  %v1201_v3 = vmax.f32 %v3029_v0, 0.0  ;;  %3137 = vmatprep.subr.bf16.mxu0 %v3252_v52 }
 0x38d   :  { %v3030_v2 = vpop.f32.mrb[46].mxu1  ;;  %v1199_v6 = vmax.f32 %v1108_v1, 0.0 }
 0x38e   :  { %v1202_v4 = vmax.f32 %v3030_v2, 0.0  ;;  %v1111_v5 = vpop.f32.mrb[47].mxu1 }
 0x38f   :  { %v1200_v7 = vmax.f32 %v1111_v5, 0.0  ;;  %3138 = vmatpush3.bf16.msra.mxu0 %v3252_v52 }
 0x390   :  { %v1226_v8 = vpack.c.bf16 %v1202_v4, %v1201_v3  ;;  %3220 = vmatprep.subr.msk.bf16.mxu0 %vm428_vm1, %v3253_v53 }
 0x391   :  { %v1225_v9 = vpack.c.bf16 %v1200_v7, %v1199_v6 }
 0x393   :  { %v3033_v10 = vpop.f32.mrb[48].mxu1  ;;  %3069 = vmatprep.mubr.msk.bf16.mxu0 %vm379_vm2, %v1225_v9  ;;  %3140 = vmatpush3.bf16.msra.mxu0 %v1915_v54 }
 0x394   :  { %v1124_v11 = vpop.f32.mrb[49].mxu1  ;;  %3070 = vmatmul.mubr.msk.bf16.gmra.mrb[76].mxu0 %vm379_vm2, %v1226_v8  ;;  %v1205_v13 = vmax.f32 %v3033_v10, 0.0 }
 0x395   :  { %v3034_v12 = vpop.f32.mrb[50].mxu1  ;;  %v1203_v16 = vmax.f32 %v1124_v11, 0.0 }
 0x396   :  { %v1206_v14 = vmax.f32 %v3034_v12, 0.0  ;;  %v1127_v15 = vpop.f32.mrb[51].mxu1 }
 0x397   :  { %v1204_v17 = vmax.f32 %v1127_v15, 0.0 }
 0x398   :  { %v1228_v18 = vpack.c.bf16 %v1206_v14, %v1205_v13 }
 0x399   :  { %v1227_v19 = vpack.c.bf16 %v1204_v17, %v1203_v16 }
 0x39b   :  { %v3037_v20 = vpop.f32.mrb[52].mxu1  ;;  %3073 = vmatprep.mubr.msk.bf16.mxu0 %vm379_vm2, %v1227_v19 }
 0x39c   :  { %v1140_v21 = vpop.f32.mrb[53].mxu1  ;;  %3074 = vmatmul.mubr.msk.bf16.gmra.mrb[80].mxu0 %vm379_vm2, %v1228_v18  ;;  %v1209_v23 = vmax.f32 %v3037_v20, 0.0 }
 0x39d   :  { %v3038_v22 = vpop.f32.mrb[54].mxu1  ;;  %v1207_v26 = vmax.f32 %v1140_v21, 0.0 }
 0x39e   :  { %v1210_v24 = vmax.f32 %v3038_v22, 0.0  ;;  %v1143_v25 = vpop.f32.mrb[55].mxu1 }
 0x39f   :  { %v1208_v27 = vmax.f32 %v1143_v25, 0.0 }
 0x3a0   :  { %v1230_v28 = vpack.c.bf16 %v1210_v24, %v1209_v23 }
 0x3a1   :  { %v1229_v29 = vpack.c.bf16 %v1208_v27, %v1207_v26 }
 0x3a3   :  { %v3041_v30 = vpop.f32.mrb[56].mxu1  ;;  %3077 = vmatprep.mubr.msk.bf16.mxu0 %vm379_vm2, %v1229_v29 }
 0x3a4   :  { %v1156_v31 = vpop.f32.mrb[57].mxu1  ;;  %3078 = vmatmul.mubr.msk.bf16.gmra.mrb[84].mxu0 %vm379_vm2, %v1230_v28  ;;  %v1213_v33 = vmax.f32 %v3041_v30, 0.0 }
 0x3a5   :  { %v3042_v32 = vpop.f32.mrb[58].mxu1  ;;  %v1211_v36 = vmax.f32 %v1156_v31, 0.0 }
 0x3a6   :  { %v1214_v34 = vmax.f32 %v3042_v32, 0.0  ;;  %v1159_v35 = vpop.f32.mrb[59].mxu1 }
 0x3a7   :  { %v1212_v37 = vmax.f32 %v1159_v35, 0.0 }
 0x3a8   :  { %v1232_v38 = vpack.c.bf16 %v1214_v34, %v1213_v33 }
 0x3a9   :  { %v1231_v39 = vpack.c.bf16 %v1212_v37, %v1211_v36 }
 0x3ab   :  { %v3045_v40 = vpop.f32.mrb[60].mxu1  ;;  %3081 = vmatprep.mubr.msk.bf16.mxu0 %vm379_vm2, %v1231_v39 }
 0x3ac   :  { %v1172_v41 = vpop.f32.mrb[61].mxu1  ;;  %3082 = vmatmul.mubr.msk.bf16.gmra.mrb[88].mxu0 %vm379_vm2, %v1232_v38  ;;  %v1217_v43 = vmax.f32 %v3045_v40, 0.0 }
 0x3ad   :  { %v3046_v42 = vpop.f32.mrb[62].mxu1  ;;  %v1215_v46 = vmax.f32 %v1172_v41, 0.0 }
 0x3ae   :  { %v1218_v44 = vmax.f32 %v3046_v42, 0.0  ;;  %v1175_v45 = vpop.f32.mrb[63].mxu1 }
 0x3af   :  { %v1216_v47 = vmax.f32 %v1175_v45, 0.0 }
 0x3b0   :  { %v1234_v48 = vpack.c.bf16 %v1218_v44, %v1217_v43 }
 0x3b1   :  { %v1233_v49 = vpack.c.bf16 %v1216_v47, %v1215_v46 }
 0x3b3   :  { %3085 = vmatprep.mubr.msk.bf16.mxu0 %vm379_vm2, %v1233_v49 }
 0x3b4   :  { %3086 = vmatmul.mubr.msk.bf16.gmra.mrb[92].mxu0 %vm379_vm2, %v1234_v48 }
 0x44f   :  { %v3059_v55 = vpop.f32.mrb[64].mxu0 }
 0x450   :  { %v1357_v56 = vpop.f32.mrb[65].mxu0  ;;  %v1486_v58 = vmax.f32 %v3059_v55, 0.0 }
 0x451   :  { %v3060_v57 = vpop.f32.mrb[66].mxu0  ;;  %v1484_v61 = vmax.f32 %v1357_v56, 0.0 }
 0x452   :  { %v1487_v59 = vmax.f32 %v3060_v57, 0.0  ;;  %v1360_v60 = vpop.f32.mrb[67].mxu0 }
 0x453   :  { %v1485_v63 = vmax.f32 %v1360_v60, 0.0 }
 0x454   :  { %v1517_v0 = vpack.c.bf16 %v1487_v59, %v1486_v58 }
 0x455   :  { %v1516_v1 = vpack.c.bf16 %v1485_v63, %v1484_v61 }
 0x457   :  { %v3063_v2 = vpop.f32.mrb[68].mxu0  ;;  %3099 = vmatprep.mubr.msk.bf16.mxu1 %vm379_vm2, %v1516_v1 }
 0x458   :  { %v1373_v3 = vpop.f32.mrb[69].mxu0  ;;  %3100 = vmatmul.mubr.msk.bf16.vlgmr.msra.gmra.mrb[64].mxu1 %vm379_vm2, %v1517_v0  ;;  %v1490_v5 = vmax.f32 %v3063_v2, 0.0 }
 0x459   :  { %v3064_v4 = vpop.f32.mrb[70].mxu0  ;;  %v1488_v8 = vmax.f32 %v1373_v3, 0.0 }
 0x45a   :  { %v1491_v6 = vmax.f32 %v3064_v4, 0.0  ;;  %v1376_v7 = vpop.f32.mrb[71].mxu0 }
 0x45b   :  { %v1489_v9 = vmax.f32 %v1376_v7, 0.0 }
 0x45c   :  { %v1519_v10 = vpack.c.bf16 %v1491_v6, %v1490_v5 }
 0x45d   :  { %v1518_v11 = vpack.c.bf16 %v1489_v9, %v1488_v8  ;;  %v3254_v8 = vld [vmem:[%s3793_s1 + $0xfc] sm:$0xff]   ;;  %v3255_v9 = vld [vmem:[%s3793_s1 + $0x104] sm:$0xff]  }
 0x45e   :  { %3173 = vmatprep.subr.bf16.mxu1 %v3254_v8 }
 0x45f   :  { %v3067_v12 = vpop.f32.mrb[72].mxu0  ;;  %3103 = vmatprep.mubr.msk.bf16.mxu1 %vm379_vm2, %v1518_v11  ;;  %3174 = vmatpush3.bf16.msra.mxu1 %v3254_v8  ;;  %v3257_v11 = vld [vmem:[%s3793_s1 + $0x114] sm:$0xff]  }
 0x460   :  { %v1389_v13 = vpop.f32.mrb[73].mxu0  ;;  %3104 = vmatmul.mubr.msk.bf16.gmra.mrb[68].mxu1 %vm379_vm2, %v1519_v10  ;;  %v1494_v15 = vmax.f32 %v3067_v12, 0.0  ;;  %3175 = vmatprep.subr.bf16.mxu1 %v3255_v9  ;;  %v3256_v10 = vld [vmem:[%s3793_s1 + $0x10c] sm:$0xff]   ;;  %v3258_v12 = vld [vmem:[%s3793_s1 + $0x11c] ss:$0 sps:$4 sm:$0xff]  }
 0x461   :  { %v3068_v14 = vpop.f32.mrb[74].mxu0  ;;  %v1492_v18 = vmax.f32 %v1389_v13, 0.0  ;;  %v2212_v13 = vsel %vm428_vm1, %v3258_v12, 0 }
 0x462   :  { %v1495_v16 = vmax.f32 %v3068_v14, 0.0  ;;  %v1392_v17 = vpop.f32.mrb[75].mxu0 }
 0x463   :  { %v1493_v19 = vmax.f32 %v1392_v17, 0.0  ;;  %3176 = vmatpush3.bf16.msra.mxu1 %v3255_v9 }
 0x464   :  { %v1521_v20 = vpack.c.bf16 %v1495_v16, %v1494_v15  ;;  %3177 = vmatprep.subr.bf16.mxu1 %v3256_v10 }
 0x465   :  { %v1520_v21 = vpack.c.bf16 %v1493_v19, %v1492_v18 }
 0x467   :  { %v3071_v22 = vpop.f32.mrb[76].mxu0  ;;  %3107 = vmatprep.mubr.msk.bf16.mxu1 %vm379_vm2, %v1520_v21  ;;  %3178 = vmatpush3.bf16.msra.mxu1 %v3256_v10 }
 0x468   :  { %v1405_v23 = vpop.f32.mrb[77].mxu0  ;;  %3108 = vmatmul.mubr.msk.bf16.gmra.mrb[72].mxu1 %vm379_vm2, %v1521_v20  ;;  %v1498_v25 = vmax.f32 %v3071_v22, 0.0  ;;  %3179 = vmatprep.subr.bf16.mxu1 %v3257_v11 }
 0x469   :  { %v3072_v24 = vpop.f32.mrb[78].mxu0  ;;  %v1496_v28 = vmax.f32 %v1405_v23, 0.0 }
 0x46a   :  { %v1499_v26 = vmax.f32 %v3072_v24, 0.0  ;;  %v1408_v27 = vpop.f32.mrb[79].mxu0 }
 0x46b   :  { %v1497_v29 = vmax.f32 %v1408_v27, 0.0  ;;  %3180 = vmatpush3.bf16.msra.mxu1 %v3257_v11 }
 0x46c   :  { %v1523_v30 = vpack.c.bf16 %v1499_v26, %v1498_v25  ;;  %3221 = vmatprep.subr.msk.bf16.mxu1 %vm428_vm1, %v3258_v12 }
 0x46d   :  { %v1522_v31 = vpack.c.bf16 %v1497_v29, %v1496_v28 }
 0x46f   :  { %v3075_v32 = vpop.f32.mrb[80].mxu0  ;;  %3111 = vmatprep.mubr.msk.bf16.mxu1 %vm379_vm2, %v1522_v31  ;;  %3182 = vmatpush3.bf16.msra.mxu1 %v2212_v13 }
 0x470   :  { %v1421_v33 = vpop.f32.mrb[81].mxu0  ;;  %3112 = vmatmul.mubr.msk.bf16.gmra.mrb[76].mxu1 %vm379_vm2, %v1523_v30  ;;  %v1502_v35 = vmax.f32 %v3075_v32, 0.0 }
 0x471   :  { %v3076_v34 = vpop.f32.mrb[82].mxu0  ;;  %v1500_v38 = vmax.f32 %v1421_v33, 0.0 }
 0x472   :  { %v1503_v36 = vmax.f32 %v3076_v34, 0.0  ;;  %v1424_v37 = vpop.f32.mrb[83].mxu0 }
 0x473   :  { %v1501_v39 = vmax.f32 %v1424_v37, 0.0 }
 0x474   :  { %v1525_v40 = vpack.c.bf16 %v1503_v36, %v1502_v35 }
 0x475   :  { %v1524_v41 = vpack.c.bf16 %v1501_v39, %v1500_v38 }
 0x477   :  { %v3079_v42 = vpop.f32.mrb[84].mxu0  ;;  %3115 = vmatprep.mubr.msk.bf16.mxu1 %vm379_vm2, %v1524_v41 }
 0x478   :  { %v1437_v43 = vpop.f32.mrb[85].mxu0  ;;  %3116 = vmatmul.mubr.msk.bf16.gmra.mrb[80].mxu1 %vm379_vm2, %v1525_v40  ;;  %v1506_v45 = vmax.f32 %v3079_v42, 0.0 }
 0x479   :  { %v3080_v44 = vpop.f32.mrb[86].mxu0  ;;  %v1504_v48 = vmax.f32 %v1437_v43, 0.0 }
 0x47a   :  { %v1507_v46 = vmax.f32 %v3080_v44, 0.0  ;;  %v1440_v47 = vpop.f32.mrb[87].mxu0 }
 0x47b   :  { %v1505_v49 = vmax.f32 %v1440_v47, 0.0 }
 0x47c   :  { %v1527_v62 = vpack.c.bf16 %v1507_v46, %v1506_v45 }
 0x47d   :  { %v1526_v50 = vpack.c.bf16 %v1505_v49, %v1504_v48 }
 0x47f   :  { %v3083_v51 = vpop.f32.mrb[88].mxu0  ;;  %3119 = vmatprep.mubr.msk.bf16.mxu1 %vm379_vm2, %v1526_v50 }
 0x480   :  { %v1453_v52 = vpop.f32.mrb[89].mxu0  ;;  %3120 = vmatmul.mubr.msk.bf16.gmra.mrb[84].mxu1 %vm379_vm2, %v1527_v62  ;;  %v1510_v54 = vmax.f32 %v3083_v51, 0.0 }
 0x481   :  { %v3084_v53 = vpop.f32.mrb[90].mxu0  ;;  %v1508_v57 = vmax.f32 %v1453_v52, 0.0 }
 0x482   :  { %v1511_v55 = vmax.f32 %v3084_v53, 0.0  ;;  %v1456_v56 = vpop.f32.mrb[91].mxu0 }
 0x483   :  { %v1509_v58 = vmax.f32 %v1456_v56, 0.0 }
 0x484   :  { %v1529_v59 = vpack.c.bf16 %v1511_v55, %v1510_v54 }
 0x485   :  { %v1528_v60 = vpack.c.bf16 %v1509_v58, %v1508_v57 }
 0x487   :  { %v3087_v61 = vpop.f32.mrb[92].mxu0  ;;  %3123 = vmatprep.mubr.msk.bf16.mxu1 %vm379_vm2, %v1528_v60 }
 0x488   :  { %v1469_v63 = vpop.f32.mrb[93].mxu0  ;;  %3124 = vmatmul.mubr.msk.bf16.gmra.mrb[88].mxu1 %vm379_vm2, %v1529_v59  ;;  %v1514_v1 = vmax.f32 %v3087_v61, 0.0 }
 0x489   :  { %v3088_v0 = vpop.f32.mrb[94].mxu0  ;;  %v1512_v4 = vmax.f32 %v1469_v63, 0.0 }
 0x48a   :  { %v1515_v2 = vmax.f32 %v3088_v0, 0.0  ;;  %v1472_v3 = vpop.f32.mrb[95].mxu0 }
 0x48b   :  { %v1513_v5 = vmax.f32 %v1472_v3, 0.0 }
 0x48c   :  { %v1531_v6 = vpack.c.bf16 %v1515_v2, %v1514_v1 }
 0x48d   :  { %v1530_v7 = vpack.c.bf16 %v1513_v5, %v1512_v4 }
 0x48f   :  { %3127 = vmatprep.mubr.msk.bf16.mxu1 %vm379_vm2, %v1530_v7 }
 0x490   :  { %3128 = vmatmul.mubr.msk.bf16.gmra.mrb[92].mxu1 %vm379_vm2, %v1531_v6 }
 0x52b   :  { %v3101_v14 = vpop.f32.mrb[64].mxu1 }
 0x52c   :  { %v1654_v15 = vpop.f32.mrb[65].mxu1  ;;  %v1783_v17 = vmax.f32 %v3101_v14, 0.0 }
 0x52d   :  { %v3102_v16 = vpop.f32.mrb[66].mxu1  ;;  %v1781_v20 = vmax.f32 %v1654_v15, 0.0 }
 0x52e   :  { %v1784_v18 = vmax.f32 %v3102_v16, 0.0  ;;  %v1657_v19 = vpop.f32.mrb[67].mxu1 }
 0x52f   :  { %v1782_v21 = vmax.f32 %v1657_v19, 0.0 }
 0x530   :  { %v1814_v22 = vpack.c.bf16 %v1784_v18, %v1783_v17 }
 0x531   :  { %v1813_v23 = vpack.c.bf16 %v1782_v21, %v1781_v20 }
 0x533   :  { %v3105_v24 = vpop.f32.mrb[68].mxu1  ;;  %3141 = vmatprep.mubr.msk.bf16.mxu0 %vm379_vm2, %v1813_v23 }
 0x534   :  { %v1670_v25 = vpop.f32.mrb[69].mxu1  ;;  %3142 = vmatmul.mubr.msk.bf16.vlgmr.msra.gmra.mrb[96].mxu0 %vm379_vm2, %v1814_v22  ;;  %v1787_v27 = vmax.f32 %v3105_v24, 0.0 }
 0x535   :  { %v3106_v26 = vpop.f32.mrb[70].mxu1  ;;  %v1785_v30 = vmax.f32 %v1670_v25, 0.0 }
 0x536   :  { %v1788_v28 = vmax.f32 %v3106_v26, 0.0  ;;  %v1673_v29 = vpop.f32.mrb[71].mxu1 }
 0x537   :  { %v1786_v31 = vmax.f32 %v1673_v29, 0.0 }
 0x538   :  { %v1816_v32 = vpack.c.bf16 %v1788_v28, %v1787_v27 }
 0x539   :  { %v1815_v33 = vpack.c.bf16 %v1786_v31, %v1785_v30 }
 0x53b   :  { %v3109_v34 = vpop.f32.mrb[72].mxu1  ;;  %3145 = vmatprep.mubr.msk.bf16.mxu0 %vm379_vm2, %v1815_v33 }
 0x53c   :  { %v1686_v35 = vpop.f32.mrb[73].mxu1  ;;  %3146 = vmatmul.mubr.msk.bf16.gmra.mrb[100].mxu0 %vm379_vm2, %v1816_v32  ;;  %v1791_v37 = vmax.f32 %v3109_v34, 0.0 }
 0x53d   :  { %v3110_v36 = vpop.f32.mrb[74].mxu1  ;;  %v1789_v40 = vmax.f32 %v1686_v35, 0.0 }
 0x53e   :  { %v1792_v38 = vmax.f32 %v3110_v36, 0.0  ;;  %v1689_v39 = vpop.f32.mrb[75].mxu1 }
 0x53f   :  { %v1790_v41 = vmax.f32 %v1689_v39, 0.0 }
 0x540   :  { %v1818_v42 = vpack.c.bf16 %v1792_v38, %v1791_v37 }
 0x541   :  { %v1817_v43 = vpack.c.bf16 %v1790_v41, %v1789_v40 }
 0x543   :  { %v3113_v44 = vpop.f32.mrb[76].mxu1  ;;  %3149 = vmatprep.mubr.msk.bf16.mxu0 %vm379_vm2, %v1817_v43 }
 0x544   :  { %v1702_v45 = vpop.f32.mrb[77].mxu1  ;;  %3150 = vmatmul.mubr.msk.bf16.gmra.mrb[104].mxu0 %vm379_vm2, %v1818_v42  ;;  %v1795_v47 = vmax.f32 %v3113_v44, 0.0 }
 0x545   :  { %v3114_v46 = vpop.f32.mrb[78].mxu1  ;;  %v1793_v62 = vmax.f32 %v1702_v45, 0.0 }
 0x546   :  { %v1796_v48 = vmax.f32 %v3114_v46, 0.0  ;;  %v1705_v49 = vpop.f32.mrb[79].mxu1 }
 0x547   :  { %v1794_v50 = vmax.f32 %v1705_v49, 0.0 }
 0x548   :  { %v1820_v51 = vpack.c.bf16 %v1796_v48, %v1795_v47 }
 0x549   :  { %v1819_v52 = vpack.c.bf16 %v1794_v50, %v1793_v62 }
 0x54b   :  { %v3117_v53 = vpop.f32.mrb[80].mxu1  ;;  %3153 = vmatprep.mubr.msk.bf16.mxu0 %vm379_vm2, %v1819_v52 }
 0x54c   :  { %v1718_v54 = vpop.f32.mrb[81].mxu1  ;;  %3154 = vmatmul.mubr.msk.bf16.gmra.mrb[108].mxu0 %vm379_vm2, %v1820_v51  ;;  %v1799_v56 = vmax.f32 %v3117_v53, 0.0 }
 0x54d   :  { %v3118_v55 = vpop.f32.mrb[82].mxu1  ;;  %v1797_v59 = vmax.f32 %v1718_v54, 0.0 }
 0x54e   :  { %v1800_v57 = vmax.f32 %v3118_v55, 0.0  ;;  %v1721_v58 = vpop.f32.mrb[83].mxu1 }
 0x54f   :  { %v1798_v60 = vmax.f32 %v1721_v58, 0.0 }
 0x550   :  { %v1822_v61 = vpack.c.bf16 %v1800_v57, %v1799_v56 }
 0x551   :  { %v1821_v63 = vpack.c.bf16 %v1798_v60, %v1797_v59 }
 0x553   :  { %v3121_v0 = vpop.f32.mrb[84].mxu1  ;;  %3157 = vmatprep.mubr.msk.bf16.mxu0 %vm379_vm2, %v1821_v63 }
 0x554   :  { %v1734_v1 = vpop.f32.mrb[85].mxu1  ;;  %3158 = vmatmul.mubr.msk.bf16.gmra.mrb[112].mxu0 %vm379_vm2, %v1822_v61  ;;  %v1803_v3 = vmax.f32 %v3121_v0, 0.0 }
 0x555   :  { %v3122_v2 = vpop.f32.mrb[86].mxu1  ;;  %v1801_v6 = vmax.f32 %v1734_v1, 0.0 }
 0x556   :  { %v1804_v4 = vmax.f32 %v3122_v2, 0.0  ;;  %v1737_v5 = vpop.f32.mrb[87].mxu1 }
 0x557   :  { %v1802_v7 = vmax.f32 %v1737_v5, 0.0 }
 0x558   :  { %v1824_v8 = vpack.c.bf16 %v1804_v4, %v1803_v3 }
 0x559   :  { %v1823_v9 = vpack.c.bf16 %v1802_v7, %v1801_v6 }
 0x55b   :  { %v3125_v10 = vpop.f32.mrb[88].mxu1  ;;  %3161 = vmatprep.mubr.msk.bf16.mxu0 %vm379_vm2, %v1823_v9 }
 0x55c   :  { %v1750_v11 = vpop.f32.mrb[89].mxu1  ;;  %3162 = vmatmul.mubr.msk.bf16.gmra.mrb[116].mxu0 %vm379_vm2, %v1824_v8  ;;  %v1807_v13 = vmax.f32 %v3125_v10, 0.0 }
 0x55d   :  { %v3126_v12 = vpop.f32.mrb[90].mxu1  ;;  %v1805_v16 = vmax.f32 %v1750_v11, 0.0 }
 0x55e   :  { %v1808_v14 = vmax.f32 %v3126_v12, 0.0  ;;  %v1753_v15 = vpop.f32.mrb[91].mxu1 }
 0x55f   :  { %v1806_v17 = vmax.f32 %v1753_v15, 0.0 }
 0x560   :  { %v1826_v18 = vpack.c.bf16 %v1808_v14, %v1807_v13 }
 0x561   :  { %v1825_v19 = vpack.c.bf16 %v1806_v17, %v1805_v16 }
 0x563   :  { %v3129_v20 = vpop.f32.mrb[92].mxu1  ;;  %3165 = vmatprep.mubr.msk.bf16.mxu0 %vm379_vm2, %v1825_v19 }
 0x564   :  { %v1766_v21 = vpop.f32.mrb[93].mxu1  ;;  %3166 = vmatmul.mubr.msk.bf16.gmra.mrb[120].mxu0 %vm379_vm2, %v1826_v18  ;;  %v1811_v23 = vmax.f32 %v3129_v20, 0.0 }
 0x565   :  { %v3130_v22 = vpop.f32.mrb[94].mxu1  ;;  %v1809_v26 = vmax.f32 %v1766_v21, 0.0 }
 0x566   :  { %v1812_v24 = vmax.f32 %v3130_v22, 0.0  ;;  %v1769_v25 = vpop.f32.mrb[95].mxu1 }
 0x567   :  { %v1810_v27 = vmax.f32 %v1769_v25, 0.0 }
 0x568   :  { %v1828_v28 = vpack.c.bf16 %v1812_v24, %v1811_v23 }
 0x569   :  { %v1827_v29 = vpack.c.bf16 %v1810_v27, %v1809_v26 }
 0x56b   :  { %3169 = vmatprep.mubr.msk.bf16.mxu0 %vm379_vm2, %v1827_v29 }
 0x56c   :  { %3170 = vmatmul.mubr.msk.bf16.gmra.mrb[124].mxu0 %vm379_vm2, %v1828_v28 }
 0x607   :  { %v3143_v30 = vpop.f32.mrb[96].mxu0 }
 0x608   :  { %v1951_v31 = vpop.f32.mrb[97].mxu0  ;;  %v2080_v33 = vmax.f32 %v3143_v30, 0.0 }
 0x609   :  { %v3144_v32 = vpop.f32.mrb[98].mxu0  ;;  %v2078_v36 = vmax.f32 %v1951_v31, 0.0 }
 0x60a   :  { %v2081_v34 = vmax.f32 %v3144_v32, 0.0  ;;  %v1954_v35 = vpop.f32.mrb[99].mxu0 }
 0x60b   :  { %v2079_v37 = vmax.f32 %v1954_v35, 0.0 }
 0x60c   :  { %v2111_v38 = vpack.c.bf16 %v2081_v34, %v2080_v33 }
 0x60d   :  { %v2110_v39 = vpack.c.bf16 %v2079_v37, %v2078_v36 }
 0x60f   :  { %v3147_v40 = vpop.f32.mrb[100].mxu0  ;;  %3183 = vmatprep.mubr.msk.bf16.mxu1 %vm379_vm2, %v2110_v39 }
 0x610   :  { %v1967_v41 = vpop.f32.mrb[101].mxu0  ;;  %3184 = vmatmul.mubr.msk.bf16.vlgmr.msra.gmra.mrb[96].mxu1 %vm379_vm2, %v2111_v38  ;;  %v2084_v43 = vmax.f32 %v3147_v40, 0.0 }
 0x611   :  { %v3148_v42 = vpop.f32.mrb[102].mxu0  ;;  %v2082_v46 = vmax.f32 %v1967_v41, 0.0 }
 0x612   :  { %v2085_v44 = vmax.f32 %v3148_v42, 0.0  ;;  %v1970_v45 = vpop.f32.mrb[103].mxu0 }
 0x613   :  { %v2083_v47 = vmax.f32 %v1970_v45, 0.0 }
 0x614   :  { %v2113_v48 = vpack.c.bf16 %v2085_v44, %v2084_v43 }
 0x615   :  { %v2112_v49 = vpack.c.bf16 %v2083_v47, %v2082_v46 }
 0x617   :  { %v3151_v62 = vpop.f32.mrb[104].mxu0  ;;  %3187 = vmatprep.mubr.msk.bf16.mxu1 %vm379_vm2, %v2112_v49 }
 0x618   :  { %v1983_v50 = vpop.f32.mrb[105].mxu0  ;;  %3188 = vmatmul.mubr.msk.bf16.gmra.mrb[100].mxu1 %vm379_vm2, %v2113_v48  ;;  %v2088_v52 = vmax.f32 %v3151_v62, 0.0 }
 0x619   :  { %v3152_v51 = vpop.f32.mrb[106].mxu0  ;;  %v2086_v55 = vmax.f32 %v1983_v50, 0.0 }
 0x61a   :  { %v2089_v53 = vmax.f32 %v3152_v51, 0.0  ;;  %v1986_v54 = vpop.f32.mrb[107].mxu0 }
 0x61b   :  { %v2087_v56 = vmax.f32 %v1986_v54, 0.0 }
 0x61c   :  { %v2115_v57 = vpack.c.bf16 %v2089_v53, %v2088_v52 }
 0x61d   :  { %v2114_v58 = vpack.c.bf16 %v2087_v56, %v2086_v55 }
 0x61f   :  { %v3155_v59 = vpop.f32.mrb[108].mxu0  ;;  %3191 = vmatprep.mubr.msk.bf16.mxu1 %vm379_vm2, %v2114_v58 }
 0x620   :  { %v1999_v60 = vpop.f32.mrb[109].mxu0  ;;  %3192 = vmatmul.mubr.msk.bf16.gmra.mrb[104].mxu1 %vm379_vm2, %v2115_v57  ;;  %v2092_v63 = vmax.f32 %v3155_v59, 0.0 }
 0x621   :  { %v3156_v61 = vpop.f32.mrb[110].mxu0  ;;  %v2090_v2 = vmax.f32 %v1999_v60, 0.0 }
 0x622   :  { %v2093_v0 = vmax.f32 %v3156_v61, 0.0  ;;  %v2002_v1 = vpop.f32.mrb[111].mxu0 }
 0x623   :  { %v2091_v3 = vmax.f32 %v2002_v1, 0.0 }
 0x624   :  { %v2117_v4 = vpack.c.bf16 %v2093_v0, %v2092_v63 }
 0x625   :  { %v2116_v5 = vpack.c.bf16 %v2091_v3, %v2090_v2 }
 0x627   :  { %v3159_v6 = vpop.f32.mrb[112].mxu0  ;;  %3195 = vmatprep.mubr.msk.bf16.mxu1 %vm379_vm2, %v2116_v5 }
 0x628   :  { %v2015_v7 = vpop.f32.mrb[113].mxu0  ;;  %3196 = vmatmul.mubr.msk.bf16.gmra.mrb[108].mxu1 %vm379_vm2, %v2117_v4  ;;  %v2096_v9 = vmax.f32 %v3159_v6, 0.0 }
 0x629   :  { %v3160_v8 = vpop.f32.mrb[114].mxu0  ;;  %v2094_v12 = vmax.f32 %v2015_v7, 0.0 }
 0x62a   :  { %v2097_v10 = vmax.f32 %v3160_v8, 0.0  ;;  %v2018_v11 = vpop.f32.mrb[115].mxu0 }
 0x62b   :  { %v2095_v13 = vmax.f32 %v2018_v11, 0.0 }
 0x62c   :  { %v2119_v14 = vpack.c.bf16 %v2097_v10, %v2096_v9 }
 0x62d   :  { %v2118_v15 = vpack.c.bf16 %v2095_v13, %v2094_v12 }
 0x62f   :  { %v3163_v16 = vpop.f32.mrb[116].mxu0  ;;  %3199 = vmatprep.mubr.msk.bf16.mxu1 %vm379_vm2, %v2118_v15 }
 0x630   :  { %v2031_v17 = vpop.f32.mrb[117].mxu0  ;;  %3200 = vmatmul.mubr.msk.bf16.gmra.mrb[112].mxu1 %vm379_vm2, %v2119_v14  ;;  %v2100_v19 = vmax.f32 %v3163_v16, 0.0 }
 0x631   :  { %v3164_v18 = vpop.f32.mrb[118].mxu0  ;;  %v2098_v22 = vmax.f32 %v2031_v17, 0.0 }
 0x632   :  { %v2101_v20 = vmax.f32 %v3164_v18, 0.0  ;;  %v2034_v21 = vpop.f32.mrb[119].mxu0 }
 0x633   :  { %v2099_v23 = vmax.f32 %v2034_v21, 0.0 }
 0x634   :  { %v2121_v24 = vpack.c.bf16 %v2101_v20, %v2100_v19 }
 0x635   :  { %v2120_v25 = vpack.c.bf16 %v2099_v23, %v2098_v22 }
 0x637   :  { %v3167_v26 = vpop.f32.mrb[120].mxu0  ;;  %3203 = vmatprep.mubr.msk.bf16.mxu1 %vm379_vm2, %v2120_v25 }
 0x638   :  { %v2047_v27 = vpop.f32.mrb[121].mxu0  ;;  %3204 = vmatmul.mubr.msk.bf16.gmra.mrb[116].mxu1 %vm379_vm2, %v2121_v24  ;;  %v2104_v29 = vmax.f32 %v3167_v26, 0.0 }
 0x639   :  { %v3168_v28 = vpop.f32.mrb[122].mxu0  ;;  %v2102_v32 = vmax.f32 %v2047_v27, 0.0 }
 0x63a   :  { %v2105_v30 = vmax.f32 %v3168_v28, 0.0  ;;  %v2050_v31 = vpop.f32.mrb[123].mxu0 }
 0x63b   :  { %v2103_v33 = vmax.f32 %v2050_v31, 0.0 }
 0x63c   :  { %v2123_v34 = vpack.c.bf16 %v2105_v30, %v2104_v29 }
 0x63d   :  { %v2122_v35 = vpack.c.bf16 %v2103_v33, %v2102_v32 }
 0x63f   :  { %v3171_v36 = vpop.f32.mrb[124].mxu0  ;;  %3207 = vmatprep.mubr.msk.bf16.mxu1 %vm379_vm2, %v2122_v35 }
 0x640   :  { %v2063_v37 = vpop.f32.mrb[125].mxu0  ;;  %3208 = vmatmul.mubr.msk.bf16.gmra.mrb[120].mxu1 %vm379_vm2, %v2123_v34  ;;  %v2108_v39 = vmax.f32 %v3171_v36, 0.0 }
 0x641   :  { %v3172_v38 = vpop.f32.mrb[126].mxu0  ;;  %v2106_v42 = vmax.f32 %v2063_v37, 0.0 }
 0x642   :  { %v2109_v40 = vmax.f32 %v3172_v38, 0.0  ;;  %v2066_v41 = vpop.f32.mrb[127].mxu0 }
 0x643   :  { %v2107_v43 = vmax.f32 %v2066_v41, 0.0 }
 0x644   :  { %v2125_v44 = vpack.c.bf16 %v2109_v40, %v2108_v39 }
 0x645   :  { %v2124_v45 = vpack.c.bf16 %v2107_v43, %v2106_v42 }
 0x647   :  { %3211 = vmatprep.mubr.msk.bf16.mxu1 %vm379_vm2, %v2124_v45 }
 0x648   :  { %3212 = vmatmul.mubr.msk.bf16.gmra.mrb[124].mxu1 %vm379_vm2, %v2125_v44 }
 0x6e3   :  { %v3185_v46 = vpop.f32.mrb[96].mxu1 }
 0x6e4   :  { %v2248_v47 = vpop.f32.mrb[97].mxu1  ;;  %v2377_v49 = vmax.f32 %v3185_v46, 0.0 }
 0x6e5   :  { %v3186_v48 = vpop.f32.mrb[98].mxu1  ;;  %v2375_v51 = vmax.f32 %v2248_v47, 0.0 }
 0x6e6   :  { %v2378_v62 = vmax.f32 %v3186_v48, 0.0  ;;  %v2251_v50 = vpop.f32.mrb[99].mxu1 }
 0x6e7   :  { %v2376_v52 = vmax.f32 %v2251_v50, 0.0 }
 0x6e8   :  { %v2408_v53 = vpack.c.bf16 %v2378_v62, %v2377_v49 }
 0x6e9   :  { %v2407_v54 = vpack.c.bf16 %v2376_v52, %v2375_v51 }
 0x6ea   :  { %v2425_v55 = vunpack.c.l.bf16 %v2408_v53  ;;  %v2426_v56 = vunpack.c.h.bf16 %v2408_v53 }
 0x6eb   :  { %v2423_v57 = vunpack.c.l.bf16 %v2407_v54  ;;  %v2424_v58 = vunpack.c.h.bf16 %v2407_v54  ;;  %v3189_v59 = vpop.f32.mrb[100].mxu1 }
 0x6ec   :  { %2457 = vst.msk [vmem:[%s3796_s3 + $0x10] sm:$0xff] %vm84_vm0, %v2425_v55  ;;  %2458 = vst.msk [vmem:[%s3796_s3 + $0x18] sm:$0xff] %vm84_vm0, %v2426_v56  ;;  %v2264_v60 = vpop.f32.mrb[101].mxu1  ;;  %v2381_v63 = vmax.f32 %v3189_v59, 0.0 }
 0x6ed   :  { %2455 = vst.msk [vmem:[%s3796_s3] sm:$0xff] %vm84_vm0, %v2423_v57  ;;  %2456 = vst.msk [vmem:[%s3796_s3 + $0x8] sm:$0xff] %vm84_vm0, %v2424_v58  ;;  %v3190_v61 = vpop.f32.mrb[102].mxu1  ;;  %v2379_v2 = vmax.f32 %v2264_v60, 0.0 }
 0x6ee   :  { %v2382_v0 = vmax.f32 %v3190_v61, 0.0  ;;  %v2267_v1 = vpop.f32.mrb[103].mxu1 }
 0x6ef   :  { %v2380_v3 = vmax.f32 %v2267_v1, 0.0 }
 0x6f0   :  { %v2410_v4 = vpack.c.bf16 %v2382_v0, %v2381_v63 }
 0x6f1   :  { %v2409_v5 = vpack.c.bf16 %v2380_v3, %v2379_v2 }
 0x6f2   :  { %v2429_v6 = vunpack.c.l.bf16 %v2410_v4  ;;  %v2430_v7 = vunpack.c.h.bf16 %v2410_v4 }
 0x6f3   :  { %v2427_v8 = vunpack.c.l.bf16 %v2409_v5  ;;  %v2428_v9 = vunpack.c.h.bf16 %v2409_v5  ;;  %v3193_v10 = vpop.f32.mrb[104].mxu1 }
 0x6f4   :  { %2461 = vst.msk [vmem:[%s3796_s3 + $0x30] sm:$0xff] %vm84_vm0, %v2429_v6  ;;  %2462 = vst.msk [vmem:[%s3796_s3 + $0x38] sm:$0xff] %vm84_vm0, %v2430_v7  ;;  %v2280_v11 = vpop.f32.mrb[105].mxu1  ;;  %v2385_v13 = vmax.f32 %v3193_v10, 0.0 }
 0x6f5   :  { %2459 = vst.msk [vmem:[%s3796_s3 + $0x20] sm:$0xff] %vm84_vm0, %v2427_v8  ;;  %2460 = vst.msk [vmem:[%s3796_s3 + $0x28] sm:$0xff] %vm84_vm0, %v2428_v9  ;;  %v3194_v12 = vpop.f32.mrb[106].mxu1  ;;  %v2383_v16 = vmax.f32 %v2280_v11, 0.0 }
 0x6f6   :  { %v2386_v14 = vmax.f32 %v3194_v12, 0.0  ;;  %v2283_v15 = vpop.f32.mrb[107].mxu1 }
 0x6f7   :  { %v2384_v17 = vmax.f32 %v2283_v15, 0.0 }
 0x6f8   :  { %v2412_v18 = vpack.c.bf16 %v2386_v14, %v2385_v13 }
 0x6f9   :  { %v2411_v19 = vpack.c.bf16 %v2384_v17, %v2383_v16 }
 0x6fa   :  { %v2433_v20 = vunpack.c.l.bf16 %v2412_v18  ;;  %v2434_v21 = vunpack.c.h.bf16 %v2412_v18 }
 0x6fb   :  { %v2431_v22 = vunpack.c.l.bf16 %v2411_v19  ;;  %v2432_v23 = vunpack.c.h.bf16 %v2411_v19  ;;  %v3197_v24 = vpop.f32.mrb[108].mxu1 }
 0x6fc   :  { %2465 = vst.msk [vmem:[%s3796_s3 + $0x50] sm:$0xff] %vm84_vm0, %v2433_v20  ;;  %2466 = vst.msk [vmem:[%s3796_s3 + $0x58] sm:$0xff] %vm84_vm0, %v2434_v21  ;;  %v2296_v25 = vpop.f32.mrb[109].mxu1  ;;  %v2389_v27 = vmax.f32 %v3197_v24, 0.0 }
 0x6fd   :  { %2463 = vst.msk [vmem:[%s3796_s3 + $0x40] sm:$0xff] %vm84_vm0, %v2431_v22  ;;  %2464 = vst.msk [vmem:[%s3796_s3 + $0x48] sm:$0xff] %vm84_vm0, %v2432_v23  ;;  %v3198_v26 = vpop.f32.mrb[110].mxu1  ;;  %v2387_v30 = vmax.f32 %v2296_v25, 0.0 }
 0x6fe   :  { %v2390_v28 = vmax.f32 %v3198_v26, 0.0  ;;  %v2299_v29 = vpop.f32.mrb[111].mxu1 }
 0x6ff   :  { %v2388_v31 = vmax.f32 %v2299_v29, 0.0 }
 0x700   :  { %v2414_v32 = vpack.c.bf16 %v2390_v28, %v2389_v27 }
 0x701   :  { %v2413_v33 = vpack.c.bf16 %v2388_v31, %v2387_v30 }
 0x702   :  { %v2437_v34 = vunpack.c.l.bf16 %v2414_v32  ;;  %v2438_v35 = vunpack.c.h.bf16 %v2414_v32 }
 0x703   :  { %v2435_v36 = vunpack.c.l.bf16 %v2413_v33  ;;  %v2436_v37 = vunpack.c.h.bf16 %v2413_v33  ;;  %v3201_v38 = vpop.f32.mrb[112].mxu1 }
 0x704   :  { %2469 = vst.msk [vmem:[%s3796_s3 + $0x70] sm:$0xff] %vm84_vm0, %v2437_v34  ;;  %2470 = vst.msk [vmem:[%s3796_s3 + $0x78] sm:$0xff] %vm84_vm0, %v2438_v35  ;;  %v2312_v39 = vpop.f32.mrb[113].mxu1  ;;  %v2393_v41 = vmax.f32 %v3201_v38, 0.0 }
 0x705   :  { %2467 = vst.msk [vmem:[%s3796_s3 + $0x60] sm:$0xff] %vm84_vm0, %v2435_v36  ;;  %2468 = vst.msk [vmem:[%s3796_s3 + $0x68] sm:$0xff] %vm84_vm0, %v2436_v37  ;;  %v3202_v40 = vpop.f32.mrb[114].mxu1  ;;  %v2391_v44 = vmax.f32 %v2312_v39, 0.0 }
 0x706   :  { %v2394_v42 = vmax.f32 %v3202_v40, 0.0  ;;  %v2315_v43 = vpop.f32.mrb[115].mxu1 }
 0x707   :  { %v2392_v45 = vmax.f32 %v2315_v43, 0.0 }
 0x708   :  { %v2416_v46 = vpack.c.bf16 %v2394_v42, %v2393_v41 }
 0x709   :  { %v2415_v47 = vpack.c.bf16 %v2392_v45, %v2391_v44 }
 0x70a   :  { %v2441_v48 = vunpack.c.l.bf16 %v2416_v46  ;;  %v2442_v49 = vunpack.c.h.bf16 %v2416_v46 }
 0x70b   :  { %v2439_v62 = vunpack.c.l.bf16 %v2415_v47  ;;  %v2440_v50 = vunpack.c.h.bf16 %v2415_v47  ;;  %v3205_v51 = vpop.f32.mrb[116].mxu1 }
 0x70c   :  { %2473 = vst.msk [vmem:[%s3796_s3 + $0x90] sm:$0xff] %vm84_vm0, %v2441_v48  ;;  %2474 = vst.msk [vmem:[%s3796_s3 + $0x98] sm:$0xff] %vm84_vm0, %v2442_v49  ;;  %v2328_v52 = vpop.f32.mrb[117].mxu1  ;;  %v2397_v54 = vmax.f32 %v3205_v51, 0.0 }
 0x70d   :  { %2471 = vst.msk [vmem:[%s3796_s3 + $0x80] sm:$0xff] %vm84_vm0, %v2439_v62  ;;  %2472 = vst.msk [vmem:[%s3796_s3 + $0x88] sm:$0xff] %vm84_vm0, %v2440_v50  ;;  %v3206_v53 = vpop.f32.mrb[118].mxu1  ;;  %v2395_v57 = vmax.f32 %v2328_v52, 0.0 }
 0x70e   :  { %v2398_v55 = vmax.f32 %v3206_v53, 0.0  ;;  %v2331_v56 = vpop.f32.mrb[119].mxu1 }
 0x70f   :  { %v2396_v58 = vmax.f32 %v2331_v56, 0.0 }
 0x710   :  { %v2418_v59 = vpack.c.bf16 %v2398_v55, %v2397_v54 }
 0x711   :  { %v2417_v60 = vpack.c.bf16 %v2396_v58, %v2395_v57 }
 0x712   :  { %v2445_v61 = vunpack.c.l.bf16 %v2418_v59  ;;  %v2446_v63 = vunpack.c.h.bf16 %v2418_v59 }
 0x713   :  { %v2443_v0 = vunpack.c.l.bf16 %v2417_v60  ;;  %v2444_v1 = vunpack.c.h.bf16 %v2417_v60  ;;  %v3209_v2 = vpop.f32.mrb[120].mxu1 }
 0x714   :  { %2477 = vst.msk [vmem:[%s3796_s3 + $0xb0] sm:$0xff] %vm84_vm0, %v2445_v61  ;;  %2478 = vst.msk [vmem:[%s3796_s3 + $0xb8] sm:$0xff] %vm84_vm0, %v2446_v63  ;;  %v2344_v3 = vpop.f32.mrb[121].mxu1  ;;  %v2401_v5 = vmax.f32 %v3209_v2, 0.0 }
 0x715   :  { %2475 = vst.msk [vmem:[%s3796_s3 + $0xa0] sm:$0xff] %vm84_vm0, %v2443_v0  ;;  %2476 = vst.msk [vmem:[%s3796_s3 + $0xa8] sm:$0xff] %vm84_vm0, %v2444_v1  ;;  %v3210_v4 = vpop.f32.mrb[122].mxu1  ;;  %v2399_v8 = vmax.f32 %v2344_v3, 0.0 }
 0x716   :  { %v2402_v6 = vmax.f32 %v3210_v4, 0.0  ;;  %v2347_v7 = vpop.f32.mrb[123].mxu1 }
 0x717   :  { %v2400_v9 = vmax.f32 %v2347_v7, 0.0 }
 0x718   :  { %v2420_v10 = vpack.c.bf16 %v2402_v6, %v2401_v5 }
 0x719   :  { %v2419_v11 = vpack.c.bf16 %v2400_v9, %v2399_v8 }
 0x71a   :  { %v2449_v12 = vunpack.c.l.bf16 %v2420_v10  ;;  %v2450_v13 = vunpack.c.h.bf16 %v2420_v10 }
 0x71b   :  { %v2447_v14 = vunpack.c.l.bf16 %v2419_v11  ;;  %v2448_v15 = vunpack.c.h.bf16 %v2419_v11  ;;  %v3213_v16 = vpop.f32.mrb[124].mxu1 }
 0x71c   :  { %2481 = vst.msk [vmem:[%s3796_s3 + $0xd0] sm:$0xff] %vm84_vm0, %v2449_v12  ;;  %2482 = vst.msk [vmem:[%s3796_s3 + $0xd8] sm:$0xff] %vm84_vm0, %v2450_v13  ;;  %v2360_v17 = vpop.f32.mrb[125].mxu1  ;;  %v2405_v19 = vmax.f32 %v3213_v16, 0.0 }
 0x71d   :  { %2479 = vst.msk [vmem:[%s3796_s3 + $0xc0] sm:$0xff] %vm84_vm0, %v2447_v14  ;;  %2480 = vst.msk [vmem:[%s3796_s3 + $0xc8] sm:$0xff] %vm84_vm0, %v2448_v15  ;;  %v3214_v18 = vpop.f32.mrb[126].mxu1  ;;  %v2403_v22 = vmax.f32 %v2360_v17, 0.0 }
 0x71e   :  { %v2406_v20 = vmax.f32 %v3214_v18, 0.0  ;;  %v2363_v21 = vpop.f32.mrb[127].mxu1 }
 0x71f   :  { %v2404_v23 = vmax.f32 %v2363_v21, 0.0 }
 0x720   :  { %v2422_v24 = vpack.c.bf16 %v2406_v20, %v2405_v19 }
 0x721   :  { %v2421_v25 = vpack.c.bf16 %v2404_v23, %v2403_v22 }
 0x722   :  { %v2453_v26 = vunpack.c.l.bf16 %v2422_v24  ;;  %v2454_v27 = vunpack.c.h.bf16 %v2422_v24 }
 0x723   :  { %v2451_v28 = vunpack.c.l.bf16 %v2421_v25  ;;  %v2452_v29 = vunpack.c.h.bf16 %v2421_v25 }
 0x724   :  { %2485 = vst.msk [vmem:[%s3796_s3 + $0xf0] sm:$0xff] %vm84_vm0, %v2453_v26  ;;  %2486 = vst.msk [vmem:[%s3796_s3 + $0xf8] sm:$0xff] %vm84_vm0, %v2454_v27 }
 0x725   :  { %2483 = vst.msk [vmem:[%s3796_s3 + $0xe0] sm:$0xff] %vm84_vm0, %v2451_v28  ;;  %2484 = vst.msk [vmem:[%s3796_s3 + $0xe8] sm:$0xff] %vm84_vm0, %v2452_v29 }

</bundles_post_ra>
